<compile_context>
chip_gen: v5e
topology: v5e:2x2
jax: 0.10.0
libtpu: 0.0.40
codegen_flags: <defaults>
</compile_context>

<pallas_src>
import functools
import math

import jax
import jax.numpy as jnp
from jax.experimental import pallas as pl
from jax.experimental.pallas import tpu as pltpu

LN_EPS = 1e-5


def _vmem_limit_bytes():
    """Generation-aware scoped-VMEM budget (don't cap v5e/v6e at a v7x size)."""
    try:
        cap = getattr(pltpu.get_tpu_info(), "vmem_capacity_bytes", None)
        if cap:
            # ~75% of physical, capped at 96 MiB (v5e/v6e -> 96 MiB, v7x -> 48 MiB)
            return int(min(cap * 3 // 4, 96 * 1024 * 1024))
    except Exception:
        pass
    return 32 * 1024 * 1024


_VMEM_LIMIT = _vmem_limit_bytes()


def _tile(dim, pref):
    """Largest tile <= pref that divides dim and is a multiple of 8; else full dim."""
    if dim <= pref:
        return dim
    t = pref
    while t >= 8:
        if dim % t == 0:
            return t
        t //= 2
    return dim  # full dim always satisfies the (8,128) block constraint


def _gelu(y):
    # TODO(synk): HF RoBERTa uses exact erf GELU; tanh approximation used here.
    c = 0.7978845608028654  # sqrt(2/pi)
    return 0.5 * y * (1.0 + jnp.tanh(c * (y + 0.044715 * y * y * y)))


# ----------------------------- Pallas kernels -----------------------------

def _linear_kernel(x_ref, w_ref, b_ref, o_ref, *, activation):
    """out = act(x @ w + b); full-K, full-N, weight VMEM-resident."""
    y = jnp.dot(x_ref[...], w_ref[...],
                preferred_element_type=jnp.float32) + b_ref[...]
    if activation == "gelu":
        y = _gelu(y)
    o_ref[...] = y.astype(o_ref.dtype)


def linear(x, w, b, activation=None, *, tm=512):
    M, K = x.shape
    _, N = w.shape
    tm = _tile(M, tm)
    cost = pl.CostEstimate(
        flops=2 * M * K * N,
        transcendentals=(M * N if activation == "gelu" else 0),
        bytes_accessed=2 * M * K + 2 * K * N + 4 * N + 2 * M * N)
    return pl.pallas_call(
        functools.partial(_linear_kernel, activation=activation),
        grid=(M // tm,),
        in_specs=[pl.BlockSpec((tm, K), lambda i: (i, 0)),
                  pl.BlockSpec((K, N), lambda i: (0, 0)),   # constant -> one DMA
                  pl.BlockSpec((1, N), lambda i: (0, 0))],
        out_specs=pl.BlockSpec((tm, N), lambda i: (i, 0)),
        out_shape=jax.ShapeDtypeStruct((M, N), jnp.bfloat16),
        compiler_params=pltpu.CompilerParams(
            dimension_semantics=("parallel",),
            vmem_limit_bytes=_VMEM_LIMIT),
        cost_estimate=cost,
    )(x, w, b.reshape(1, N))


def _qkv_kernel(x_ref, w_ref, b_ref, o_ref):
    """Fused QKV projection; output split into (3, tm, H) in the epilogue."""
    h = o_ref.shape[2]
    y = jnp.dot(x_ref[...], w_ref[...],
                preferred_element_type=jnp.float32) + b_ref[...]
    y = y.astype(o_ref.dtype)
    o_ref[0] = y[:, :h]
    o_ref[1] = y[:, h:2 * h]
    o_ref[2] = y[:, 2 * h:]


def qkv_projection(x, w, b, *, tm=512):
    """x @ w_qkv + b written as (3, M, H) so attention reads Q/K/V in place."""
    M, K = x.shape
    N = w.shape[1]
    H = N // 3
    tm = _tile(M, tm)
    cost = pl.CostEstimate(
        flops=2 * M * K * N, transcendentals=0,
        bytes_accessed=2 * M * K + 2 * K * N + 4 * N + 2 * M * N)
    return pl.pallas_call(
        _qkv_kernel,
        grid=(M // tm,),
        in_specs=[pl.BlockSpec((tm, K), lambda i: (i, 0)),
                  pl.BlockSpec((K, N), lambda i: (0, 0)),
                  pl.BlockSpec((1, N), lambda i: (0, 0))],
        out_specs=pl.BlockSpec((3, tm, H), lambda i: (0, i, 0)),
        out_shape=jax.ShapeDtypeStruct((3, M, H), jnp.bfloat16),
        compiler_params=pltpu.CompilerParams(
            dimension_semantics=("parallel",),
            vmem_limit_bytes=_VMEM_LIMIT),
        cost_estimate=cost,
    )(x, w, b.reshape(1, N))


def _linear_res_ln_kernel(x_ref, w_ref, b_ref, r_ref, g_ref, bb_ref, o_ref):
    """out = LayerNorm(x @ w + b + residual); full-K, weight VMEM-resident."""
    y = jnp.dot(x_ref[...], w_ref[...], preferred_element_type=jnp.float32)
    y = y + b_ref[...] + r_ref[...].astype(jnp.float32)
    mu = jnp.mean(y, axis=-1, keepdims=True)
    d = y - mu
    var = jnp.mean(d * d, axis=-1, keepdims=True)
    inv = jax.lax.rsqrt(var + LN_EPS)
    o_ref[...] = ((d * inv) * g_ref[...] + bb_ref[...]).astype(o_ref.dtype)


def linear_residual_ln(x, w, b, residual, gamma, beta, *, tm=512):
    M, K = x.shape
    _, N = w.shape
    tm = _tile(M, tm)
    cost = pl.CostEstimate(
        flops=2 * M * K * N, transcendentals=0,
        bytes_accessed=2 * M * K + 2 * K * N + 4 * M * N)
    return pl.pallas_call(
        _linear_res_ln_kernel,
        grid=(M // tm,),
        in_specs=[pl.BlockSpec((tm, K), lambda i: (i, 0)),
                  pl.BlockSpec((K, N), lambda i: (0, 0)),   # constant -> one DMA
                  pl.BlockSpec((1, N), lambda i: (0, 0)),
                  pl.BlockSpec((tm, N), lambda i: (i, 0)),
                  pl.BlockSpec((1, N), lambda i: (0, 0)),
                  pl.BlockSpec((1, N), lambda i: (0, 0))],
        out_specs=pl.BlockSpec((tm, N), lambda i: (i, 0)),
        out_shape=jax.ShapeDtypeStruct((M, N), jnp.bfloat16),
        compiler_params=pltpu.CompilerParams(
            dimension_semantics=("parallel",),
            vmem_limit_bytes=_VMEM_LIMIT),
        cost_estimate=cost,
    )(x, w, b.reshape(1, N), residual, gamma.reshape(1, N), beta.reshape(1, N))


def _ln_kernel(x_ref, g_ref, b_ref, o_ref):
    x = x_ref[...].astype(jnp.float32)
    mu = jnp.mean(x, axis=-1, keepdims=True)
    d = x - mu
    var = jnp.mean(d * d, axis=-1, keepdims=True)
    inv = jax.lax.rsqrt(var + LN_EPS)
    o_ref[...] = ((d * inv) * g_ref[...] + b_ref[...]).astype(o_ref.dtype)


def layernorm(x, gamma, beta, *, tm=512):
    M, H = x.shape
    tm = _tile(M, tm)
    return pl.pallas_call(
        _ln_kernel,
        grid=(M // tm,),
        in_specs=[pl.BlockSpec((tm, H), lambda i: (i, 0)),
                  pl.BlockSpec((1, H), lambda i: (0, 0)),
                  pl.BlockSpec((1, H), lambda i: (0, 0))],
        out_specs=pl.BlockSpec((tm, H), lambda i: (i, 0)),
        out_shape=jax.ShapeDtypeStruct((M, H), jnp.bfloat16),
        compiler_params=pltpu.CompilerParams(
            dimension_semantics=("parallel",),
            vmem_limit_bytes=_VMEM_LIMIT),
    )(x, gamma.reshape(1, H), beta.reshape(1, H))


def _flash_attn_kernel(q_ref, k_ref, v_ref, o_ref, m_sc, l_sc, acc_sc,
                       *, num_heads):
    """Online-softmax attention, head-batched compute.

    Q/K/V blocks are (1, 1, t, H) views of the (3, B, S, H) fused-QKV output.
    Per kv step the heads are gathered once into (nh, t, dh) and all
    score/softmax/PV math runs batched over the head axis (full-ref scratch
    updates, no per-head lane slicing in the hot path). Scratch: m,l
    (nh, tq, 1) f32; acc (nh, tq, dh) f32. Grid = (B, S/tq, S/tk), kv last.
    The 1/sqrt(dh) softmax scale is pre-folded into the Q projection weights.
    """
    ki = pl.program_id(2)

    @pl.when(ki == 0)
    def _():
        m_sc[...] = jnp.full_like(m_sc, -jnp.inf)
        l_sc[...] = jnp.zeros_like(l_sc)
        acc_sc[...] = jnp.zeros_like(acc_sc)

    H = q_ref.shape[3]
    dh = H // num_heads

    def split_heads(x):                       # (t, H) -> (nh, t, dh)
        return jnp.concatenate(
            [x[None, :, h * dh:(h + 1) * dh] for h in range(num_heads)], axis=0)

    q = split_heads(q_ref[0, 0])              # (nh, tq, dh) bf16
    k = split_heads(k_ref[0, 0])              # (nh, tk, dh) bf16
    v = split_heads(v_ref[0, 0])              # (nh, tk, dh) bf16

    # head-batched QK^T (contracting dh directly -> no per-head transpose)
    s = jnp.einsum('hqd,hkd->hqk', q, k,
                   preferred_element_type=jnp.float32)           # (nh, tq, tk)
    m_prev = m_sc[...]                                            # (nh, tq, 1)
    m_new = jnp.maximum(m_prev, s.max(axis=-1, keepdims=True))
    alpha = jnp.exp(m_prev - m_new)
    p = jnp.exp(s - m_new)
    l_sc[...] = alpha * l_sc[...] + p.sum(axis=-1, keepdims=True)
    acc_sc[...] = alpha * acc_sc[...] + jnp.einsum(
        'hqk,hkd->hqd', p.astype(v.dtype), v,
        preferred_element_type=jnp.float32)                       # (nh, tq, dh)
    m_sc[...] = m_new

    @pl.when(ki == pl.num_programs(2) - 1)
    def _():
        out = acc_sc[...] * pl.reciprocal(l_sc[...], approx=True)
        # one lane-dense (tq, H) writeback; head re-interleave once per q tile
        o_ref[0] = jnp.concatenate([out[h] for h in range(num_heads)],
                                   axis=-1).astype(o_ref.dtype)


def flash_attention(qkv, num_heads, *, tq=256, tk=512):
    """qkv: (3, B, S, H) from the fused projection. Returns (B, S, H)."""
    _, B, S, H = qkv.shape
    dh = H // num_heads
    tq, tk = _tile(S, tq), _tile(S, tk)
    return pl.pallas_call(
        functools.partial(_flash_attn_kernel, num_heads=num_heads),
        grid=(B, S // tq, S // tk),
        in_specs=[
            pl.BlockSpec((1, 1, tq, H), lambda b, qi, ki: (0, b, qi, 0)),  # Q
            pl.BlockSpec((1, 1, tk, H), lambda b, qi, ki: (1, b, ki, 0)),  # K
            pl.BlockSpec((1, 1, tk, H), lambda b, qi, ki: (2, b, ki, 0)),  # V
        ],
        out_specs=pl.BlockSpec((1, tq, H), lambda b, qi, ki: (b, qi, 0)),
        out_shape=jax.ShapeDtypeStruct((B, S, H), qkv.dtype),
        scratch_shapes=[
            pltpu.VMEM((num_heads, tq, 1), jnp.float32),    # running max m
            pltpu.VMEM((num_heads, tq, 1), jnp.float32),    # running sum l
            pltpu.VMEM((num_heads, tq, dh), jnp.float32),   # acc
        ],
        compiler_params=pltpu.CompilerParams(
            dimension_semantics=("parallel", "parallel", "arbitrary"),
            vmem_limit_bytes=_VMEM_LIMIT),
    )(qkv, qkv, qkv)


# --------------------------- functional forward ----------------------------

def _encoder_forward(params, src, *, num_heads, hidden):
    B, S = src.shape
    H = hidden

    # RoBERTa position ids: padding-aware cumsum (padding_idx = 1).
    mask = (src != 1).astype(jnp.int32)
    pos_ids = jnp.cumsum(mask, axis=1) * mask + 1

    # Embedding gathers are glue and stay in plain JAX.
    x = (params["word_emb"][src]
         + params["pos_emb"][pos_ids]
         + params["type_emb"][0])
    x = x.reshape(B * S, H)
    x = layernorm(x, params["emb_ln_g"], params["emb_ln_b"])     # bf16 [B*S, H]

    for lp in params["layers"]:
        # fused QKV projection -> (3, B*S, H); attention reads it in place
        qkv = qkv_projection(x, lp["w_qkv"], lp["b_qkv"])
        ctx = flash_attention(qkv.reshape(3, B, S, H), num_heads)   # [B, S, H]

        # attention out-proj fused with residual-add + LayerNorm
        x = linear_residual_ln(ctx.reshape(B * S, H), lp["wo"], lp["bo"], x,
                               lp["ln1_g"], lp["ln1_b"])

        # FFN: w1 + GELU, then w2 fused with residual-add + LayerNorm
        hdn = linear(x, lp["w1"], lp["b1"], activation="gelu")
        x = linear_residual_ln(hdn, lp["w2"], lp["b2"], x,
                               lp["ln2_g"], lp["ln2_b"])

    return x.reshape(B, S, H).astype(jnp.float32)


# --------------------------- Encoder (wrapper) -----------------------------

class Encoder:
    """Mirrors modules/model/encoder.py: forward(src) returns last_hidden_state."""

    def __init__(self, impl):
        self.is_initialized = False
        self.impl = impl

    @classmethod
    def init_from_config(cls, impl, encoder_kwargs, language=None):
        module = cls(impl)
        if impl == "bert":
            # TODO(synk): reference loads pretrained RoBERTa/Camembert weights via
            # from_pretrained; deterministic synthetic parameters are used here.
            module._init_params(**encoder_kwargs)
        else:
            raise NotImplementedError
        module.is_initialized = True
        return module

    def _init_params(self, vocab_size, max_position, hidden, num_heads,
                     ffn_dim, num_layers, seed=0):
        assert hidden % num_heads == 0
        self.hidden = hidden
        self.num_heads = num_heads
        head_dim = hidden // num_heads
        scale = 1.0 / math.sqrt(head_dim)

        key = jax.random.PRNGKey(seed)

        def nrm(k, shape):
            return 0.02 * jax.random.normal(k, shape, dtype=jnp.float32)

        key, k1, k2, k3 = jax.random.split(key, 4)
        params = dict(
            word_emb=nrm(k1, (vocab_size, hidden)),
            pos_emb=nrm(k2, (max_position, hidden)),
            type_emb=nrm(k3, (1, hidden)),
            emb_ln_g=jnp.ones((hidden,), jnp.float32),
            emb_ln_b=jnp.zeros((hidden,), jnp.float32),
            layers=[],
        )

        for _ in range(num_layers):
            key, kq, kk, kv, ko, kf1, kf2 = jax.random.split(key, 7)
            wq = nrm(kq, (hidden, hidden)) * scale   # fold 1/sqrt(dh) into Wq
            wk = nrm(kk, (hidden, hidden))
            wv = nrm(kv, (hidden, hidden))
            layer = dict(
                w_qkv=jnp.concatenate([wq, wk, wv], axis=1).astype(jnp.bfloat16),
                b_qkv=jnp.zeros((3 * hidden,), jnp.float32),
                wo=nrm(ko, (hidden, hidden)).astype(jnp.bfloat16),
                bo=jnp.zeros((hidden,), jnp.float32),
                ln1_g=jnp.ones((hidden,), jnp.float32),
                ln1_b=jnp.zeros((hidden,), jnp.float32),
                w1=nrm(kf1, (hidden, ffn_dim)).astype(jnp.bfloat16),
                b1=jnp.zeros((ffn_dim,), jnp.float32),
                w2=nrm(kf2, (ffn_dim, hidden)).astype(jnp.bfloat16),
                b2=jnp.zeros((hidden,), jnp.float32),
                ln2_g=jnp.ones((hidden,), jnp.float32),
                ln2_b=jnp.zeros((hidden,), jnp.float32),
            )
            params["layers"].append(layer)

        self.params = params
        self._fwd = jax.jit(functools.partial(
            _encoder_forward, num_heads=num_heads, hidden=hidden))

    def forward(self, src, lengths=None):
        assert self.is_initialized
        if self.impl != "bert":
            raise NotImplementedError
        # TODO(synk): `lengths` is ignored — matches the reference, which calls
        # self.model(src) without an attention mask.
        return self._fwd(self.params, src)

    __call__ = forward


# --------------------------------- main ------------------------------------

if __name__ == "__main__":
    B, S = 2, 8
    cfg = dict(vocab_size=100, max_position=64, hidden=32,
               num_heads=4, ffn_dim=64, num_layers=2, seed=0)

    enc = Encoder.init_from_config("bert", cfg, language="en")

    key = jax.random.PRNGKey(0)
    src = jax.random.randint(key, (B, S), minval=3, maxval=cfg["vocab_size"],
                             dtype=jnp.int32)

    out = enc(src)
    out = jax.block_until_ready(out)
    assert out.shape == (B, S, cfg["hidden"]), out.shape
    assert out.dtype == jnp.float32
    assert bool(jnp.all(jnp.isfinite(out)))
    print("KERNEL_OK")
</pallas_src>

<mosaic_0001>
module attributes {stable_mosaic.version = 11 : i64} {
  func.func @_ln_kernel(%arg0: i32, %arg1: memref<16x32xf32, #tpu.memory_space<vmem>>, %arg2: memref<1x32xf32, #tpu.memory_space<vmem>>, %arg3: memref<1x32xf32, #tpu.memory_space<vmem>>, %arg4: memref<16x32xbf16, #tpu.memory_space<vmem>>) attributes {dimension_semantics = [#tpu.dimension_semantics<parallel>], iteration_bounds = array<i64: 1>, scalar_prefetch = 0 : i64, scratch_operands = 0 : i64, tpu.core_type = #tpu.core_type<tc>, window_params = [{transform_indices = @transform_0, window_bounds = array<i64: 16, 32>}, {pipeline_mode = #tpu.pipeline_mode<synchronous>, transform_indices = @transform_1, window_bounds = array<i64: 1, 32>}, {pipeline_mode = #tpu.pipeline_mode<synchronous>, transform_indices = @transform_2, window_bounds = array<i64: 1, 32>}, {transform_indices = @transform_3, window_bounds = array<i64: 16, 32>}]} {
    %c0 = arith.constant 0 : index
    %c0_0 = arith.constant 0 : index
    %0 = vector.load %arg1[%c0, %c0_0] : memref<16x32xf32, #tpu.memory_space<vmem>>, vector<16x32xf32>
    %cst = arith.constant dense<0.000000e+00> : vector<16xf32>
    %1 = vector.multi_reduction <add>, %0, %cst [1] : vector<16x32xf32> to vector<16xf32>
    %2 = vector.shape_cast %1 : vector<16xf32> to vector<16x1xf32>
    %cst_1 = arith.constant 3.200000e+01 : f32
    %3 = vector.broadcast %cst_1 : f32 to vector<16x1xf32>
    %4 = arith.divf %2, %3 : vector<16x1xf32>
    %5 = vector.broadcast %4 : vector<16x1xf32> to vector<16x32xf32>
    %6 = arith.subf %0, %5 : vector<16x32xf32>
    %7 = arith.mulf %6, %6 : vector<16x32xf32>
    %cst_2 = arith.constant dense<0.000000e+00> : vector<16xf32>
    %8 = vector.multi_reduction <add>, %7, %cst_2 [1] : vector<16x32xf32> to vector<16xf32>
    %9 = vector.shape_cast %8 : vector<16xf32> to vector<16x1xf32>
    %cst_3 = arith.constant 3.200000e+01 : f32
    %10 = vector.broadcast %cst_3 : f32 to vector<16x1xf32>
    %11 = arith.divf %9, %10 : vector<16x1xf32>
    %cst_4 = arith.constant 9.99999974E-6 : f32
    %12 = vector.broadcast %cst_4 : f32 to vector<16x1xf32>
    %13 = arith.addf %11, %12 : vector<16x1xf32>
    %14 = math.rsqrt %13 : vector<16x1xf32>
    %15 = vector.broadcast %14 : vector<16x1xf32> to vector<16x32xf32>
    %16 = arith.mulf %6, %15 : vector<16x32xf32>
    %c0_5 = arith.constant 0 : index
    %c0_6 = arith.constant 0 : index
    %17 = vector.load %arg2[%c0_5, %c0_6] : memref<1x32xf32, #tpu.memory_space<vmem>>, vector<1x32xf32>
    %18 = vector.broadcast %17 : vector<1x32xf32> to vector<16x32xf32>
    %19 = arith.mulf %16, %18 : vector<16x32xf32>
    %c0_7 = arith.constant 0 : index
    %c0_8 = arith.constant 0 : index
    %20 = vector.load %arg3[%c0_7, %c0_8] : memref<1x32xf32, #tpu.memory_space<vmem>>, vector<1x32xf32>
    %21 = vector.broadcast %20 : vector<1x32xf32> to vector<16x32xf32>
    %22 = arith.addf %19, %21 : vector<16x32xf32>
    %23 = arith.truncf %22 : vector<16x32xf32> to vector<16x32xbf16>
    %c0_9 = arith.constant 0 : index
    %c0_10 = arith.constant 0 : index
    %24 = vector.load %arg4[%c0_9, %c0_10] : memref<16x32xbf16, #tpu.memory_space<vmem>>, vector<16x32xbf16>
    tpu.vector_store %arg4[%c0_9, %c0_10], %23 {strides = array<i32>} : memref<16x32xbf16, #tpu.memory_space<vmem>>, vector<16x32xbf16>,
    return
  }
  func.func @transform_0(%arg0: i32) -> (i32, i32) {
    %c0_i32 = arith.constant 0 : i32
    %c0_i32_0 = arith.constant 0 : i32
    return %arg0, %c0_i32 : i32, i32
  }
  func.func @transform_1(%arg0: i32) -> (i32, i32) {
    %c0_i32 = arith.constant 0 : i32
    %c0_i32_0 = arith.constant 0 : i32
    %c0_i32_1 = arith.constant 0 : i32
    return %c0_i32, %c0_i32_0 : i32, i32
  }
  func.func @transform_2(%arg0: i32) -> (i32, i32) {
    %c0_i32 = arith.constant 0 : i32
    %c0_i32_0 = arith.constant 0 : i32
    %c0_i32_1 = arith.constant 0 : i32
    return %c0_i32, %c0_i32_0 : i32, i32
  }
  func.func @transform_3(%arg0: i32) -> (i32, i32) {
    %c0_i32 = arith.constant 0 : i32
    %c0_i32_0 = arith.constant 0 : i32
    return %arg0, %c0_i32 : i32, i32
  }
}

module attributes {stable_mosaic.version = 11 : i64} {
  func.func @_qkv_kernel(%arg0: i32, %arg1: memref<16x32xbf16, #tpu.memory_space<vmem>>, %arg2: memref<32x96xbf16, #tpu.memory_space<vmem>>, %arg3: memref<1x96xf32, #tpu.memory_space<vmem>>, %arg4: memref<3x16x32xbf16, #tpu.memory_space<vmem>>) attributes {dimension_semantics = [#tpu.dimension_semantics<parallel>], iteration_bounds = array<i64: 1>, scalar_prefetch = 0 : i64, scratch_operands = 0 : i64, tpu.core_type = #tpu.core_type<tc>, window_params = [{transform_indices = @transform_0, window_bounds = array<i64: 16, 32>}, {pipeline_mode = #tpu.pipeline_mode<synchronous>, transform_indices = @transform_1, window_bounds = array<i64: 32, 96>}, {pipeline_mode = #tpu.pipeline_mode<synchronous>, transform_indices = @transform_2, window_bounds = array<i64: 1, 96>}, {transform_indices = @transform_3, window_bounds = array<i64: 3, 16, 32>}]} {
    %c0 = arith.constant 0 : index
    %c0_0 = arith.constant 0 : index
    %0 = vector.load %arg1[%c0, %c0_0] : memref<16x32xbf16, #tpu.memory_space<vmem>>, vector<16x32xbf16>
    %c0_1 = arith.constant 0 : index
    %c0_2 = arith.constant 0 : index
    %1 = vector.load %arg2[%c0_1, %c0_2] : memref<32x96xbf16, #tpu.memory_space<vmem>>, vector<32x96xbf16>
    %cst = arith.constant dense<0.000000e+00> : vector<16x96xf32>
    %2 = tpu.matmul %0, %1, %cst {dimension_numbers = #tpu.dot_dimension_numbers<[1], [0], [0], [1], [0, 0, 1, 1], [], []>} : vector<16x32xbf16>, vector<32x96xbf16>, vector<16x96xf32> -> vector<16x96xf32>
    %c0_3 = arith.constant 0 : index
    %c0_4 = arith.constant 0 : index
    %3 = vector.load %arg3[%c0_3, %c0_4] : memref<1x96xf32, #tpu.memory_space<vmem>>, vector<1x96xf32>
    %4 = vector.broadcast %3 : vector<1x96xf32> to vector<16x96xf32>
    %5 = arith.addf %2, %4 : vector<16x96xf32>
    %6 = arith.truncf %5 : vector<16x96xf32> to vector<16x96xbf16>
    %7 = vector.extract_strided_slice %6 {offsets = [0, 0], sizes = [16, 32], strides = [1, 1]} : vector<16x96xbf16> to vector<16x32xbf16>
    %c0_5 = arith.constant 0 : index
    %c0_6 = arith.constant 0 : index
    %c0_7 = arith.constant 0 : index
    %8 = vector.load %arg4[%c0_5, %c0_6, %c0_7] : memref<3x16x32xbf16, #tpu.memory_space<vmem>>, vector<1x16x32xbf16>
    %9 = vector.shape_cast %8 : vector<1x16x32xbf16> to vector<16x32xbf16>
    %10 = vector.shape_cast %7 : vector<16x32xbf16> to vector<1x16x32xbf16>
    tpu.vector_store %arg4[%c0_5, %c0_6, %c0_7], %10 {strides = array<i32>} : memref<3x16x32xbf16, #tpu.memory_space<vmem>>, vector<1x16x32xbf16>,
    %11 = vector.extract_strided_slice %6 {offsets = [0, 32], sizes = [16, 32], strides = [1, 1]} : vector<16x96xbf16> to vector<16x32xbf16>
    %c1 = arith.constant 1 : index
    %c0_8 = arith.constant 0 : index
    %c0_9 = arith.constant 0 : index
    %12 = vector.load %arg4[%c1, %c0_8, %c0_9] : memref<3x16x32xbf16, #tpu.memory_space<vmem>>, vector<1x16x32xbf16>
    %13 = vector.shape_cast %12 : vector<1x16x32xbf16> to vector<16x32xbf16>
    %14 = vector.shape_cast %11 : vector<16x32xbf16> to vector<1x16x32xbf16>
    tpu.vector_store %arg4[%c1, %c0_8, %c0_9], %14 {strides = array<i32>} : memref<3x16x32xbf16, #tpu.memory_space<vmem>>, vector<1x16x32xbf16>,
    %15 = vector.extract_strided_slice %6 {offsets = [0, 64], sizes = [16, 32], strides = [1, 1]} : vector<16x96xbf16> to vector<16x32xbf16>
    %c2 = arith.constant 2 : index
    %c0_10 = arith.constant 0 : index
    %c0_11 = arith.constant 0 : index
    %16 = vector.load %arg4[%c2, %c0_10, %c0_11] : memref<3x16x32xbf16, #tpu.memory_space<vmem>>, vector<1x16x32xbf16>
    %17 = vector.shape_cast %16 : vector<1x16x32xbf16> to vector<16x32xbf16>
    %18 = vector.shape_cast %15 : vector<16x32xbf16> to vector<1x16x32xbf16>
    tpu.vector_store %arg4[%c2, %c0_10, %c0_11], %18 {strides = array<i32>} : memref<3x16x32xbf16, #tpu.memory_space<vmem>>, vector<1x16x32xbf16>,
    return
  }
  func.func @transform_0(%arg0: i32) -> (i32, i32) {
    %c0_i32 = arith.constant 0 : i32
    %c0_i32_0 = arith.constant 0 : i32
    return %arg0, %c0_i32 : i32, i32
  }
  func.func @transform_1(%arg0: i32) -> (i32, i32) {
    %c0_i32 = arith.constant 0 : i32
    %c0_i32_0 = arith.constant 0 : i32
    %c0_i32_1 = arith.constant 0 : i32
    return %c0_i32, %c0_i32_0 : i32, i32
  }
  func.func @transform_2(%arg0: i32) -> (i32, i32) {
    %c0_i32 = arith.constant 0 : i32
    %c0_i32_0 = arith.constant 0 : i32
    %c0_i32_1 = arith.constant 0 : i32
    return %c0_i32, %c0_i32_0 : i32, i32
  }
  func.func @transform_3(%arg0: i32) -> (i32, i32, i32) {
    %c0_i32 = arith.constant 0 : i32
    %c0_i32_0 = arith.constant 0 : i32
    %c0_i32_1 = arith.constant 0 : i32
    return %c0_i32, %arg0, %c0_i32_0 : i32, i32, i32
  }
}

module attributes {stable_mosaic.version = 11 : i64} {
  func.func @_linear_res_ln_kernel(%arg0: i32, %arg1: memref<16x32xbf16, #tpu.memory_space<vmem>>, %arg2: memref<32x32xbf16, #tpu.memory_space<vmem>>, %arg3: memref<1x32xf32, #tpu.memory_space<vmem>>, %arg4: memref<16x32xbf16, #tpu.memory_space<vmem>>, %arg5: memref<1x32xf32, #tpu.memory_space<vmem>>, %arg6: memref<1x32xf32, #tpu.memory_space<vmem>>, %arg7: memref<16x32xbf16, #tpu.memory_space<vmem>>) attributes {dimension_semantics = [#tpu.dimension_semantics<parallel>], iteration_bounds = array<i64: 1>, scalar_prefetch = 0 : i64, scratch_operands = 0 : i64, tpu.core_type = #tpu.core_type<tc>, window_params = [{transform_indices = @transform_0, window_bounds = array<i64: 16, 32>}, {pipeline_mode = #tpu.pipeline_mode<synchronous>, transform_indices = @transform_1, window_bounds = array<i64: 32, 32>}, {pipeline_mode = #tpu.pipeline_mode<synchronous>, transform_indices = @transform_2, window_bounds = array<i64: 1, 32>}, {transform_indices = @transform_3, window_bounds = array<i64: 16, 32>}, {pipeline_mode = #tpu.pipeline_mode<synchronous>, transform_indices = @transform_4, window_bounds = array<i64: 1, 32>}, {pipeline_mode = #tpu.pipeline_mode<synchronous>, transform_indices = @transform_5, window_bounds = array<i64: 1, 32>}, {transform_indices = @transform_6, window_bounds = array<i64: 16, 32>}]} {
    %c0 = arith.constant 0 : index
    %c0_0 = arith.constant 0 : index
    %0 = vector.load %arg1[%c0, %c0_0] : memref<16x32xbf16, #tpu.memory_space<vmem>>, vector<16x32xbf16>
    %c0_1 = arith.constant 0 : index
    %c0_2 = arith.constant 0 : index
    %1 = vector.load %arg2[%c0_1, %c0_2] : memref<32x32xbf16, #tpu.memory_space<vmem>>, vector<32x32xbf16>
    %cst = arith.constant dense<0.000000e+00> : vector<16x32xf32>
    %2 = tpu.matmul %0, %1, %cst {dimension_numbers = #tpu.dot_dimension_numbers<[1], [0], [0], [1], [0, 0, 1, 1], [], []>} : vector<16x32xbf16>, vector<32x32xbf16>, vector<16x32xf32> -> vector<16x32xf32>
    %c0_3 = arith.constant 0 : index
    %c0_4 = arith.constant 0 : index
    %3 = vector.load %arg3[%c0_3, %c0_4] : memref<1x32xf32, #tpu.memory_space<vmem>>, vector<1x32xf32>
    %4 = vector.broadcast %3 : vector<1x32xf32> to vector<16x32xf32>
    %5 = arith.addf %2, %4 : vector<16x32xf32>
    %c0_5 = arith.constant 0 : index
    %c0_6 = arith.constant 0 : index
    %6 = vector.load %arg4[%c0_5, %c0_6] : memref<16x32xbf16, #tpu.memory_space<vmem>>, vector<16x32xbf16>
    %7 = arith.extf %6 : vector<16x32xbf16> to vector<16x32xf32>
    %8 = arith.addf %5, %7 : vector<16x32xf32>
    %cst_7 = arith.constant dense<0.000000e+00> : vector<16xf32>
    %9 = vector.multi_reduction <add>, %8, %cst_7 [1] : vector<16x32xf32> to vector<16xf32>
    %10 = vector.shape_cast %9 : vector<16xf32> to vector<16x1xf32>
    %cst_8 = arith.constant 3.200000e+01 : f32
    %11 = vector.broadcast %cst_8 : f32 to vector<16x1xf32>
    %12 = arith.divf %10, %11 : vector<16x1xf32>
    %13 = vector.broadcast %12 : vector<16x1xf32> to vector<16x32xf32>
    %14 = arith.subf %8, %13 : vector<16x32xf32>
    %15 = arith.mulf %14, %14 : vector<16x32xf32>
    %cst_9 = arith.constant dense<0.000000e+00> : vector<16xf32>
    %16 = vector.multi_reduction <add>, %15, %cst_9 [1] : vector<16x32xf32> to vector<16xf32>
    %17 = vector.shape_cast %16 : vector<16xf32> to vector<16x1xf32>
    %cst_10 = arith.constant 3.200000e+01 : f32
    %18 = vector.broadcast %cst_10 : f32 to vector<16x1xf32>
    %19 = arith.divf %17, %18 : vector<16x1xf32>
    %cst_11 = arith.constant 9.99999974E-6 : f32
    %20 = vector.broadcast %cst_11 : f32 to vector<16x1xf32>
    %21 = arith.addf %19, %20 : vector<16x1xf32>
    %22 = math.rsqrt %21 : vector<16x1xf32>
    %23 = vector.broadcast %22 : vector<16x1xf32> to vector<16x32xf32>
    %24 = arith.mulf %14, %23 : vector<16x32xf32>
    %c0_12 = arith.constant 0 : index
    %c0_13 = arith.constant 0 : index
    %25 = vector.load %arg5[%c0_12, %c0_13] : memref<1x32xf32, #tpu.memory_space<vmem>>, vector<1x32xf32>
    %26 = vector.broadcast %25 : vector<1x32xf32> to vector<16x32xf32>
    %27 = arith.mulf %24, %26 : vector<16x32xf32>
    %c0_14 = arith.constant 0 : index
    %c0_15 = arith.constant 0 : index
    %28 = vector.load %arg6[%c0_14, %c0_15] : memref<1x32xf32, #tpu.memory_space<vmem>>, vector<1x32xf32>
    %29 = vector.broadcast %28 : vector<1x32xf32> to vector<16x32xf32>
    %30 = arith.addf %27, %29 : vector<16x32xf32>
    %31 = arith.truncf %30 : vector<16x32xf32> to vector<16x32xbf16>
    %c0_16 = arith.constant 0 : index
    %c0_17 = arith.constant 0 : index
    %32 = vector.load %arg7[%c0_16, %c0_17] : memref<16x32xbf16, #tpu.memory_space<vmem>>, vector<16x32xbf16>
    tpu.vector_store %arg7[%c0_16, %c0_17], %31 {strides = array<i32>} : memref<16x32xbf16, #tpu.memory_space<vmem>>, vector<16x32xbf16>,
    return
  }
  func.func @transform_0(%arg0: i32) -> (i32, i32) {
    %c0_i32 = arith.constant 0 : i32
    %c0_i32_0 = arith.constant 0 : i32
    return %arg0, %c0_i32 : i32, i32
  }
  func.func @transform_1(%arg0: i32) -> (i32, i32) {
    %c0_i32 = arith.constant 0 : i32
    %c0_i32_0 = arith.constant 0 : i32
    %c0_i32_1 = arith.constant 0 : i32
    return %c0_i32, %c0_i32_0 : i32, i32
  }
  func.func @transform_2(%arg0: i32) -> (i32, i32) {
    %c0_i32 = arith.constant 0 : i32
    %c0_i32_0 = arith.constant 0 : i32
    %c0_i32_1 = arith.constant 0 : i32
    return %c0_i32, %c0_i32_0 : i32, i32
  }
  func.func @transform_3(%arg0: i32) -> (i32, i32) {
    %c0_i32 = arith.constant 0 : i32
    %c0_i32_0 = arith.constant 0 : i32
    return %arg0, %c0_i32 : i32, i32
  }
  func.func @transform_4(%arg0: i32) -> (i32, i32) {
    %c0_i32 = arith.constant 0 : i32
    %c0_i32_0 = arith.constant 0 : i32
    %c0_i32_1 = arith.constant 0 : i32
    return %c0_i32, %c0_i32_0 : i32, i32
  }
  func.func @transform_5(%arg0: i32) -> (i32, i32) {
    %c0_i32 = arith.constant 0 : i32
    %c0_i32_0 = arith.constant 0 : i32
    %c0_i32_1 = arith.constant 0 : i32
    return %c0_i32, %c0_i32_0 : i32, i32
  }
  func.func @transform_6(%arg0: i32) -> (i32, i32) {
    %c0_i32 = arith.constant 0 : i32
    %c0_i32_0 = arith.constant 0 : i32
    return %arg0, %c0_i32 : i32, i32
  }
}

module attributes {stable_mosaic.version = 11 : i64} {
  func.func @_flash_attn_kernel(%arg0: i32, %arg1: i32, %arg2: i32, %arg3: memref<1x1x8x32xbf16, #tpu.memory_space<vmem>>, %arg4: memref<1x1x8x32xbf16, #tpu.memory_space<vmem>>, %arg5: memref<1x1x8x32xbf16, #tpu.memory_space<vmem>>, %arg6: memref<1x8x32xbf16, #tpu.memory_space<vmem>>, %arg7: memref<4x8x1xf32, #tpu.memory_space<vmem>>, %arg8: memref<4x8x1xf32, #tpu.memory_space<vmem>>, %arg9: memref<4x8x8xf32, #tpu.memory_space<vmem>>) attributes {dimension_semantics = [#tpu.dimension_semantics<parallel>, #tpu.dimension_semantics<parallel>, #tpu.dimension_semantics<arbitrary>], iteration_bounds = array<i64: 2, 1, 1>, scalar_prefetch = 0 : i64, scratch_operands = 3 : i64, tpu.core_type = #tpu.core_type<tc>, window_params = [{transform_indices = @transform_0, window_bounds = array<i64: 1, 1, 8, 32>}, {transform_indices = @transform_1, window_bounds = array<i64: 1, 1, 8, 32>}, {transform_indices = @transform_2, window_bounds = array<i64: 1, 1, 8, 32>}, {transform_indices = @transform_3, window_bounds = array<i64: 1, 8, 32>}]} {
    %c0_i32 = arith.constant 0 : i32
    %0 = arith.cmpi eq, %arg2, %c0_i32 : i32
    %1 = arith.extui %0 : i1 to i32
    %c0_i32_0 = arith.constant 0 : i32
    %2 = arith.cmpi ne, %1, %c0_i32_0 : i32
    scf.if %2 {
      %cst_35 = arith.constant 0xFF800000 : f32
      %63 = vector.broadcast %cst_35 : f32 to vector<4x8x1xf32>
      %c0_36 = arith.constant 0 : index
      %c0_37 = arith.constant 0 : index
      %c0_38 = arith.constant 0 : index
      %64 = vector.load %arg7[%c0_36, %c0_37, %c0_38] : memref<4x8x1xf32, #tpu.memory_space<vmem>>, vector<4x8x1xf32>
      tpu.vector_store %arg7[%c0_36, %c0_37, %c0_38], %63 {strides = array<i32>} : memref<4x8x1xf32, #tpu.memory_space<vmem>>, vector<4x8x1xf32>,
      %cst_39 = arith.constant 0.000000e+00 : f32
      %65 = vector.broadcast %cst_39 : f32 to vector<4x8x1xf32>
      %c0_40 = arith.constant 0 : index
      %c0_41 = arith.constant 0 : index
      %c0_42 = arith.constant 0 : index
      %66 = vector.load %arg8[%c0_40, %c0_41, %c0_42] : memref<4x8x1xf32, #tpu.memory_space<vmem>>, vector<4x8x1xf32>
      tpu.vector_store %arg8[%c0_40, %c0_41, %c0_42], %65 {strides = array<i32>} : memref<4x8x1xf32, #tpu.memory_space<vmem>>, vector<4x8x1xf32>,
      %cst_43 = arith.constant 0.000000e+00 : f32
      %67 = vector.broadcast %cst_43 : f32 to vector<4x8x8xf32>
      %c0_44 = arith.constant 0 : index
      %c0_45 = arith.constant 0 : index
      %c0_46 = arith.constant 0 : index
      %68 = vector.load %arg9[%c0_44, %c0_45, %c0_46] : memref<4x8x8xf32, #tpu.memory_space<vmem>>, vector<4x8x8xf32>
      tpu.vector_store %arg9[%c0_44, %c0_45, %c0_46], %67 {strides = array<i32>} : memref<4x8x8xf32, #tpu.memory_space<vmem>>, vector<4x8x8xf32>,
    } else {
    }
    %c0 = arith.constant 0 : index
    %c0_1 = arith.constant 0 : index
    %c0_2 = arith.constant 0 : index
    %c0_3 = arith.constant 0 : index
    %3 = vector.load %arg3[%c0, %c0_1, %c0_2, %c0_3] : memref<1x1x8x32xbf16, #tpu.memory_space<vmem>>, vector<1x1x8x32xbf16>
    %4 = vector.shape_cast %3 : vector<1x1x8x32xbf16> to vector<8x32xbf16>
    %5 = vector.extract_strided_slice %4 {offsets = [0, 0], sizes = [8, 8], strides = [1, 1]} : vector<8x32xbf16> to vector<8x8xbf16>
    %6 = vector.shape_cast %5 : vector<8x8xbf16> to vector<1x8x8xbf16>
    %7 = vector.extract_strided_slice %4 {offsets = [0, 8], sizes = [8, 8], strides = [1, 1]} : vector<8x32xbf16> to vector<8x8xbf16>
    %8 = vector.shape_cast %7 : vector<8x8xbf16> to vector<1x8x8xbf16>
    %9 = vector.extract_strided_slice %4 {offsets = [0, 16], sizes = [8, 8], strides = [1, 1]} : vector<8x32xbf16> to vector<8x8xbf16>
    %10 = vector.shape_cast %9 : vector<8x8xbf16> to vector<1x8x8xbf16>
    %11 = vector.extract_strided_slice %4 {offsets = [0, 24], sizes = [8, 8], strides = [1, 1]} : vector<8x32xbf16> to vector<8x8xbf16>
    %12 = vector.shape_cast %11 : vector<8x8xbf16> to vector<1x8x8xbf16>
    %13 = tpu.concatenate %6, %8, %10, %12 in 0 : vector<1x8x8xbf16>, vector<1x8x8xbf16>, vector<1x8x8xbf16>, vector<1x8x8xbf16> -> vector<4x8x8xbf16>
    %c0_4 = arith.constant 0 : index
    %c0_5 = arith.constant 0 : index
    %c0_6 = arith.constant 0 : index
    %c0_7 = arith.constant 0 : index
    %14 = vector.load %arg4[%c0_4, %c0_5, %c0_6, %c0_7] : memref<1x1x8x32xbf16, #tpu.memory_space<vmem>>, vector<1x1x8x32xbf16>
    %15 = vector.shape_cast %14 : vector<1x1x8x32xbf16> to vector<8x32xbf16>
    %16 = vector.extract_strided_slice %15 {offsets = [0, 0], sizes = [8, 8], strides = [1, 1]} : vector<8x32xbf16> to vector<8x8xbf16>
    %17 = vector.shape_cast %16 : vector<8x8xbf16> to vector<1x8x8xbf16>
    %18 = vector.extract_strided_slice %15 {offsets = [0, 8], sizes = [8, 8], strides = [1, 1]} : vector<8x32xbf16> to vector<8x8xbf16>
    %19 = vector.shape_cast %18 : vector<8x8xbf16> to vector<1x8x8xbf16>
    %20 = vector.extract_strided_slice %15 {offsets = [0, 16], sizes = [8, 8], strides = [1, 1]} : vector<8x32xbf16> to vector<8x8xbf16>
    %21 = vector.shape_cast %20 : vector<8x8xbf16> to vector<1x8x8xbf16>
    %22 = vector.extract_strided_slice %15 {offsets = [0, 24], sizes = [8, 8], strides = [1, 1]} : vector<8x32xbf16> to vector<8x8xbf16>
    %23 = vector.shape_cast %22 : vector<8x8xbf16> to vector<1x8x8xbf16>
    %24 = tpu.concatenate %17, %19, %21, %23 in 0 : vector<1x8x8xbf16>, vector<1x8x8xbf16>, vector<1x8x8xbf16>, vector<1x8x8xbf16> -> vector<4x8x8xbf16>
    %c0_8 = arith.constant 0 : index
    %c0_9 = arith.constant 0 : index
    %c0_10 = arith.constant 0 : index
    %c0_11 = arith.constant 0 : index
    %25 = vector.load %arg5[%c0_8, %c0_9, %c0_10, %c0_11] : memref<1x1x8x32xbf16, #tpu.memory_space<vmem>>, vector<1x1x8x32xbf16>
    %26 = vector.shape_cast %25 : vector<1x1x8x32xbf16> to vector<8x32xbf16>
    %27 = vector.extract_strided_slice %26 {offsets = [0, 0], sizes = [8, 8], strides = [1, 1]} : vector<8x32xbf16> to vector<8x8xbf16>
    %28 = vector.shape_cast %27 : vector<8x8xbf16> to vector<1x8x8xbf16>
    %29 = vector.extract_strided_slice %26 {offsets = [0, 8], sizes = [8, 8], strides = [1, 1]} : vector<8x32xbf16> to vector<8x8xbf16>
    %30 = vector.shape_cast %29 : vector<8x8xbf16> to vector<1x8x8xbf16>
    %31 = vector.extract_strided_slice %26 {offsets = [0, 16], sizes = [8, 8], strides = [1, 1]} : vector<8x32xbf16> to vector<8x8xbf16>
    %32 = vector.shape_cast %31 : vector<8x8xbf16> to vector<1x8x8xbf16>
    %33 = vector.extract_strided_slice %26 {offsets = [0, 24], sizes = [8, 8], strides = [1, 1]} : vector<8x32xbf16> to vector<8x8xbf16>
    %34 = vector.shape_cast %33 : vector<8x8xbf16> to vector<1x8x8xbf16>
    %35 = tpu.concatenate %28, %30, %32, %34 in 0 : vector<1x8x8xbf16>, vector<1x8x8xbf16>, vector<1x8x8xbf16>, vector<1x8x8xbf16> -> vector<4x8x8xbf16>
    "tpu.trace_start"() <{level = 10 : i32, message = "hqd,hkd->hqk"}> : () -> ()
    %cst = arith.constant dense<0.000000e+00> : vector<4x8x8xf32>
    %36 = tpu.matmul %13, %24, %cst {dimension_numbers = #tpu.dot_dimension_numbers<[2], [2], [1], [1], [0, 0, 0, 1, 1, 1], [0], [0]>} : vector<4x8x8xbf16>, vector<4x8x8xbf16>, vector<4x8x8xf32> -> vector<4x8x8xf32>
    "tpu.trace_stop"() : () -> ()
    %c0_12 = arith.constant 0 : index
    %c0_13 = arith.constant 0 : index
    %c0_14 = arith.constant 0 : index
    %37 = vector.load %arg7[%c0_12, %c0_13, %c0_14] : memref<4x8x1xf32, #tpu.memory_space<vmem>>, vector<4x8x1xf32>
    %cst_15 = arith.constant dense<0xFF800000> : vector<4x8xf32>
    %38 = vector.multi_reduction <maximumf>, %36, %cst_15 [2] : vector<4x8x8xf32> to vector<4x8xf32>
    %39 = vector.shape_cast %38 : vector<4x8xf32> to vector<4x8x1xf32>
    %40 = arith.maximumf %37, %39 : vector<4x8x1xf32>
    %41 = arith.subf %37, %40 : vector<4x8x1xf32>
    %42 = math.exp %41 : vector<4x8x1xf32>
    %43 = vector.broadcast %40 : vector<4x8x1xf32> to vector<4x8x8xf32>
    %44 = arith.subf %36, %43 : vector<4x8x8xf32>
    %45 = math.exp %44 : vector<4x8x8xf32>
    %c0_16 = arith.constant 0 : index
    %c0_17 = arith.constant 0 : index
    %c0_18 = arith.constant 0 : index
    %46 = vector.load %arg8[%c0_16, %c0_17, %c0_18] : memref<4x8x1xf32, #tpu.memory_space<vmem>>, vector<4x8x1xf32>
    %47 = arith.mulf %42, %46 : vector<4x8x1xf32>
    %cst_19 = arith.constant dense<0.000000e+00> : vector<4x8xf32>
    %48 = vector.multi_reduction <add>, %45, %cst_19 [2] : vector<4x8x8xf32> to vector<4x8xf32>
    %49 = vector.shape_cast %48 : vector<4x8xf32> to vector<4x8x1xf32>
    %50 = arith.addf %47, %49 : vector<4x8x1xf32>
    %c0_20 = arith.constant 0 : index
    %c0_21 = arith.constant 0 : index
    %c0_22 = arith.constant 0 : index
    %51 = vector.load %arg8[%c0_20, %c0_21, %c0_22] : memref<4x8x1xf32, #tpu.memory_space<vmem>>, vector<4x8x1xf32>
    tpu.vector_store %arg8[%c0_20, %c0_21, %c0_22], %50 {strides = array<i32>} : memref<4x8x1xf32, #tpu.memory_space<vmem>>, vector<4x8x1xf32>,
    %c0_23 = arith.constant 0 : index
    %c0_24 = arith.constant 0 : index
    %c0_25 = arith.constant 0 : index
    %52 = vector.load %arg9[%c0_23, %c0_24, %c0_25] : memref<4x8x8xf32, #tpu.memory_space<vmem>>, vector<4x8x8xf32>
    %53 = vector.broadcast %42 : vector<4x8x1xf32> to vector<4x8x8xf32>
    %54 = arith.mulf %53, %52 : vector<4x8x8xf32>
    %55 = arith.truncf %45 : vector<4x8x8xf32> to vector<4x8x8xbf16>
    "tpu.trace_start"() <{level = 10 : i32, message = "hqk,hkd->hqd"}> : () -> ()
    %cst_26 = arith.constant dense<0.000000e+00> : vector<4x8x8xf32>
    %56 = tpu.matmul %55, %35, %cst_26 {dimension_numbers = #tpu.dot_dimension_numbers<[2], [1], [1], [2], [0, 0, 0, 1, 1, 2], [0], [0]>} : vector<4x8x8xbf16>, vector<4x8x8xbf16>, vector<4x8x8xf32> -> vector<4x8x8xf32>
    "tpu.trace_stop"() : () -> ()
    %57 = arith.addf %54, %56 : vector<4x8x8xf32>
    %c0_27 = arith.constant 0 : index
    %c0_28 = arith.constant 0 : index
    %c0_29 = arith.constant 0 : index
    %58 = vector.load %arg9[%c0_27, %c0_28, %c0_29] : memref<4x8x8xf32, #tpu.memory_space<vmem>>, vector<4x8x8xf32>
    tpu.vector_store %arg9[%c0_27, %c0_28, %c0_29], %57 {strides = array<i32>} : memref<4x8x8xf32, #tpu.memory_space<vmem>>, vector<4x8x8xf32>,
    %c0_30 = arith.constant 0 : index
    %c0_31 = arith.constant 0 : index
    %c0_32 = arith.constant 0 : index
    %59 = vector.load %arg7[%c0_30, %c0_31, %c0_32] : memref<4x8x1xf32, #tpu.memory_space<vmem>>, vector<4x8x1xf32>
    tpu.vector_store %arg7[%c0_30, %c0_31, %c0_32], %40 {strides = array<i32>} : memref<4x8x1xf32, #tpu.memory_space<vmem>>, vector<4x8x1xf32>,
    %c0_i32_33 = arith.constant 0 : i32
    %60 = arith.cmpi eq, %arg2, %c0_i32_33 : i32
    %61 = arith.extui %60 : i1 to i32
    %c0_i32_34 = arith.constant 0 : i32
    %62 = arith.cmpi ne, %61, %c0_i32_34 : i32
    scf.if %62 {
      %c0_35 = arith.constant 0 : index
      %c0_36 = arith.constant 0 : index
      %c0_37 = arith.constant 0 : index
      %63 = vector.load %arg9[%c0_35, %c0_36, %c0_37] : memref<4x8x8xf32, #tpu.memory_space<vmem>>, vector<4x8x8xf32>
      %c0_38 = arith.constant 0 : index
      %c0_39 = arith.constant 0 : index
      %c0_40 = arith.constant 0 : index
      %64 = vector.load %arg8[%c0_38, %c0_39, %c0_40] : memref<4x8x1xf32, #tpu.memory_space<vmem>>, vector<4x8x1xf32>
      %65 = tpu.reciprocal %64 {approx = true} : vector<4x8x1xf32> -> vector<4x8x1xf32>
      %66 = vector.broadcast %65 : vector<4x8x1xf32> to vector<4x8x8xf32>
      %67 = arith.mulf %63, %66 : vector<4x8x8xf32>
      %68 = vector.extract_strided_slice %67 {offsets = [0, 0, 0], sizes = [1, 8, 8], strides = [1, 1, 1]} : vector<4x8x8xf32> to vector<1x8x8xf32>
      %69 = vector.shape_cast %68 : vector<1x8x8xf32> to vector<8x8xf32>
      %70 = vector.extract_strided_slice %67 {offsets = [1, 0, 0], sizes = [1, 8, 8], strides = [1, 1, 1]} : vector<4x8x8xf32> to vector<1x8x8xf32>
      %71 = vector.shape_cast %70 : vector<1x8x8xf32> to vector<8x8xf32>
      %72 = vector.extract_strided_slice %67 {offsets = [2, 0, 0], sizes = [1, 8, 8], strides = [1, 1, 1]} : vector<4x8x8xf32> to vector<1x8x8xf32>
      %73 = vector.shape_cast %72 : vector<1x8x8xf32> to vector<8x8xf32>
      %74 = vector.extract_strided_slice %67 {offsets = [3, 0, 0], sizes = [1, 8, 8], strides = [1, 1, 1]} : vector<4x8x8xf32> to vector<1x8x8xf32>
      %75 = vector.shape_cast %74 : vector<1x8x8xf32> to vector<8x8xf32>
      %76 = tpu.concatenate %69, %71, %73, %75 in 1 : vector<8x8xf32>, vector<8x8xf32>, vector<8x8xf32>, vector<8x8xf32> -> vector<8x32xf32>
      %77 = arith.truncf %76 : vector<8x32xf32> to vector<8x32xbf16>
      %c0_41 = arith.constant 0 : index
      %c0_42 = arith.constant 0 : index
      %c0_43 = arith.constant 0 : index
      %78 = vector.load %arg6[%c0_41, %c0_42, %c0_43] : memref<1x8x32xbf16, #tpu.memory_space<vmem>>, vector<1x8x32xbf16>
      %79 = vector.shape_cast %78 : vector<1x8x32xbf16> to vector<8x32xbf16>
      %80 = vector.shape_cast %77 : vector<8x32xbf16> to vector<1x8x32xbf16>
      tpu.vector_store %arg6[%c0_41, %c0_42, %c0_43], %80 {strides = array<i32>} : memref<1x8x32xbf16, #tpu.memory_space<vmem>>, vector<1x8x32xbf16>,
    } else {
    }
    return
  }
  func.func @transform_0(%arg0: i32, %arg1: i32, %arg2: i32) -> (i32, i32, i32, i32) {
    %c0_i32 = arith.constant 0 : i32
    %c0_i32_0 = arith.constant 0 : i32
    %c0_i32_1 = arith.constant 0 : i32
    return %c0_i32, %arg0, %arg1, %c0_i32_0 : i32, i32, i32, i32
  }
  func.func @transform_1(%arg0: i32, %arg1: i32, %arg2: i32) -> (i32, i32, i32, i32) {
    %c1_i32 = arith.constant 1 : i32
    %c0_i32 = arith.constant 0 : i32
    %c0_i32_0 = arith.constant 0 : i32
    return %c1_i32, %arg0, %arg2, %c0_i32 : i32, i32, i32, i32
  }
  func.func @transform_2(%arg0: i32, %arg1: i32, %arg2: i32) -> (i32, i32, i32, i32) {
    %c2_i32 = arith.constant 2 : i32
    %c0_i32 = arith.constant 0 : i32
    %c0_i32_0 = arith.constant 0 : i32
    return %c2_i32, %arg0, %arg2, %c0_i32 : i32, i32, i32, i32
  }
  func.func @transform_3(%arg0: i32, %arg1: i32, %arg2: i32) -> (i32, i32, i32) {
    %c0_i32 = arith.constant 0 : i32
    %c0_i32_0 = arith.constant 0 : i32
    return %arg0, %arg1, %c0_i32 : i32, i32, i32
  }
}

module attributes {stable_mosaic.version = 11 : i64} {
  func.func @_linear_kernel(%arg0: i32, %arg1: memref<16x32xbf16, #tpu.memory_space<vmem>>, %arg2: memref<32x64xbf16, #tpu.memory_space<vmem>>, %arg3: memref<1x64xf32, #tpu.memory_space<vmem>>, %arg4: memref<16x64xbf16, #tpu.memory_space<vmem>>) attributes {dimension_semantics = [#tpu.dimension_semantics<parallel>], iteration_bounds = array<i64: 1>, scalar_prefetch = 0 : i64, scratch_operands = 0 : i64, tpu.core_type = #tpu.core_type<tc>, window_params = [{transform_indices = @transform_0, window_bounds = array<i64: 16, 32>}, {pipeline_mode = #tpu.pipeline_mode<synchronous>, transform_indices = @transform_1, window_bounds = array<i64: 32, 64>}, {pipeline_mode = #tpu.pipeline_mode<synchronous>, transform_indices = @transform_2, window_bounds = array<i64: 1, 64>}, {transform_indices = @transform_3, window_bounds = array<i64: 16, 64>}]} {
    %c0 = arith.constant 0 : index
    %c0_0 = arith.constant 0 : index
    %0 = vector.load %arg1[%c0, %c0_0] : memref<16x32xbf16, #tpu.memory_space<vmem>>, vector<16x32xbf16>
    %c0_1 = arith.constant 0 : index
    %c0_2 = arith.constant 0 : index
    %1 = vector.load %arg2[%c0_1, %c0_2] : memref<32x64xbf16, #tpu.memory_space<vmem>>, vector<32x64xbf16>
    %cst = arith.constant dense<0.000000e+00> : vector<16x64xf32>
    %2 = tpu.matmul %0, %1, %cst {dimension_numbers = #tpu.dot_dimension_numbers<[1], [0], [0], [1], [0, 0, 1, 1], [], []>} : vector<16x32xbf16>, vector<32x64xbf16>, vector<16x64xf32> -> vector<16x64xf32>
    %c0_3 = arith.constant 0 : index
    %c0_4 = arith.constant 0 : index
    %3 = vector.load %arg3[%c0_3, %c0_4] : memref<1x64xf32, #tpu.memory_space<vmem>>, vector<1x64xf32>
    %4 = vector.broadcast %3 : vector<1x64xf32> to vector<16x64xf32>
    %5 = arith.addf %2, %4 : vector<16x64xf32>
    %cst_5 = arith.constant 5.000000e-01 : f32
    %6 = vector.broadcast %cst_5 : f32 to vector<16x64xf32>
    %7 = arith.mulf %6, %5 : vector<16x64xf32>
    %cst_6 = arith.constant 4.471500e-02 : f32
    %8 = vector.broadcast %cst_6 : f32 to vector<16x64xf32>
    %9 = arith.mulf %8, %5 : vector<16x64xf32>
    %10 = arith.mulf %9, %5 : vector<16x64xf32>
    %11 = arith.mulf %10, %5 : vector<16x64xf32>
    %12 = arith.addf %5, %11 : vector<16x64xf32>
    %cst_7 = arith.constant 0.797884583 : f32
    %13 = vector.broadcast %cst_7 : f32 to vector<16x64xf32>
    %14 = arith.mulf %13, %12 : vector<16x64xf32>
    %15 = math.tanh %14 : vector<16x64xf32>
    %cst_8 = arith.constant 1.000000e+00 : f32
    %16 = vector.broadcast %cst_8 : f32 to vector<16x64xf32>
    %17 = arith.addf %16, %15 : vector<16x64xf32>
    %18 = arith.mulf %7, %17 : vector<16x64xf32>
    %19 = arith.truncf %18 : vector<16x64xf32> to vector<16x64xbf16>
    %c0_9 = arith.constant 0 : index
    %c0_10 = arith.constant 0 : index
    %20 = vector.load %arg4[%c0_9, %c0_10] : memref<16x64xbf16, #tpu.memory_space<vmem>>, vector<16x64xbf16>
    tpu.vector_store %arg4[%c0_9, %c0_10], %19 {strides = array<i32>} : memref<16x64xbf16, #tpu.memory_space<vmem>>, vector<16x64xbf16>,
    return
  }
  func.func @transform_0(%arg0: i32) -> (i32, i32) {
    %c0_i32 = arith.constant 0 : i32
    %c0_i32_0 = arith.constant 0 : i32
    return %arg0, %c0_i32 : i32, i32
  }
  func.func @transform_1(%arg0: i32) -> (i32, i32) {
    %c0_i32 = arith.constant 0 : i32
    %c0_i32_0 = arith.constant 0 : i32
    %c0_i32_1 = arith.constant 0 : i32
    return %c0_i32, %c0_i32_0 : i32, i32
  }
  func.func @transform_2(%arg0: i32) -> (i32, i32) {
    %c0_i32 = arith.constant 0 : i32
    %c0_i32_0 = arith.constant 0 : i32
    %c0_i32_1 = arith.constant 0 : i32
    return %c0_i32, %c0_i32_0 : i32, i32
  }
  func.func @transform_3(%arg0: i32) -> (i32, i32) {
    %c0_i32 = arith.constant 0 : i32
    %c0_i32_0 = arith.constant 0 : i32
    return %arg0, %c0_i32 : i32, i32
  }
}

module attributes {stable_mosaic.version = 11 : i64} {
  func.func @_linear_res_ln_kernel(%arg0: i32, %arg1: memref<16x64xbf16, #tpu.memory_space<vmem>>, %arg2: memref<64x32xbf16, #tpu.memory_space<vmem>>, %arg3: memref<1x32xf32, #tpu.memory_space<vmem>>, %arg4: memref<16x32xbf16, #tpu.memory_space<vmem>>, %arg5: memref<1x32xf32, #tpu.memory_space<vmem>>, %arg6: memref<1x32xf32, #tpu.memory_space<vmem>>, %arg7: memref<16x32xbf16, #tpu.memory_space<vmem>>) attributes {dimension_semantics = [#tpu.dimension_semantics<parallel>], iteration_bounds = array<i64: 1>, scalar_prefetch = 0 : i64, scratch_operands = 0 : i64, tpu.core_type = #tpu.core_type<tc>, window_params = [{transform_indices = @transform_0, window_bounds = array<i64: 16, 64>}, {pipeline_mode = #tpu.pipeline_mode<synchronous>, transform_indices = @transform_1, window_bounds = array<i64: 64, 32>}, {pipeline_mode = #tpu.pipeline_mode<synchronous>, transform_indices = @transform_2, window_bounds = array<i64: 1, 32>}, {transform_indices = @transform_3, window_bounds = array<i64: 16, 32>}, {pipeline_mode = #tpu.pipeline_mode<synchronous>, transform_indices = @transform_4, window_bounds = array<i64: 1, 32>}, {pipeline_mode = #tpu.pipeline_mode<synchronous>, transform_indices = @transform_5, window_bounds = array<i64: 1, 32>}, {transform_indices = @transform_6, window_bounds = array<i64: 16, 32>}]} {
    %c0 = arith.constant 0 : index
    %c0_0 = arith.constant 0 : index
    %0 = vector.load %arg1[%c0, %c0_0] : memref<16x64xbf16, #tpu.memory_space<vmem>>, vector<16x64xbf16>
    %c0_1 = arith.constant 0 : index
    %c0_2 = arith.constant 0 : index
    %1 = vector.load %arg2[%c0_1, %c0_2] : memref<64x32xbf16, #tpu.memory_space<vmem>>, vector<64x32xbf16>
    %cst = arith.constant dense<0.000000e+00> : vector<16x32xf32>
    %2 = tpu.matmul %0, %1, %cst {dimension_numbers = #tpu.dot_dimension_numbers<[1], [0], [0], [1], [0, 0, 1, 1], [], []>} : vector<16x64xbf16>, vector<64x32xbf16>, vector<16x32xf32> -> vector<16x32xf32>
    %c0_3 = arith.constant 0 : index
    %c0_4 = arith.constant 0 : index
    %3 = vector.load %arg3[%c0_3, %c0_4] : memref<1x32xf32, #tpu.memory_space<vmem>>, vector<1x32xf32>
    %4 = vector.broadcast %3 : vector<1x32xf32> to vector<16x32xf32>
    %5 = arith.addf %2, %4 : vector<16x32xf32>
    %c0_5 = arith.constant 0 : index
    %c0_6 = arith.constant 0 : index
    %6 = vector.load %arg4[%c0_5, %c0_6] : memref<16x32xbf16, #tpu.memory_space<vmem>>, vector<16x32xbf16>
    %7 = arith.extf %6 : vector<16x32xbf16> to vector<16x32xf32>
    %8 = arith.addf %5, %7 : vector<16x32xf32>
    %cst_7 = arith.constant dense<0.000000e+00> : vector<16xf32>
    %9 = vector.multi_reduction <add>, %8, %cst_7 [1] : vector<16x32xf32> to vector<16xf32>
    %10 = vector.shape_cast %9 : vector<16xf32> to vector<16x1xf32>
    %cst_8 = arith.constant 3.200000e+01 : f32
    %11 = vector.broadcast %cst_8 : f32 to vector<16x1xf32>
    %12 = arith.divf %10, %11 : vector<16x1xf32>
    %13 = vector.broadcast %12 : vector<16x1xf32> to vector<16x32xf32>
    %14 = arith.subf %8, %13 : vector<16x32xf32>
    %15 = arith.mulf %14, %14 : vector<16x32xf32>
    %cst_9 = arith.constant dense<0.000000e+00> : vector<16xf32>
    %16 = vector.multi_reduction <add>, %15, %cst_9 [1] : vector<16x32xf32> to vector<16xf32>
    %17 = vector.shape_cast %16 : vector<16xf32> to vector<16x1xf32>
    %cst_10 = arith.constant 3.200000e+01 : f32
    %18 = vector.broadcast %cst_10 : f32 to vector<16x1xf32>
    %19 = arith.divf %17, %18 : vector<16x1xf32>
    %cst_11 = arith.constant 9.99999974E-6 : f32
    %20 = vector.broadcast %cst_11 : f32 to vector<16x1xf32>
    %21 = arith.addf %19, %20 : vector<16x1xf32>
    %22 = math.rsqrt %21 : vector<16x1xf32>
    %23 = vector.broadcast %22 : vector<16x1xf32> to vector<16x32xf32>
    %24 = arith.mulf %14, %23 : vector<16x32xf32>
    %c0_12 = arith.constant 0 : index
    %c0_13 = arith.constant 0 : index
    %25 = vector.load %arg5[%c0_12, %c0_13] : memref<1x32xf32, #tpu.memory_space<vmem>>, vector<1x32xf32>
    %26 = vector.broadcast %25 : vector<1x32xf32> to vector<16x32xf32>
    %27 = arith.mulf %24, %26 : vector<16x32xf32>
    %c0_14 = arith.constant 0 : index
    %c0_15 = arith.constant 0 : index
    %28 = vector.load %arg6[%c0_14, %c0_15] : memref<1x32xf32, #tpu.memory_space<vmem>>, vector<1x32xf32>
    %29 = vector.broadcast %28 : vector<1x32xf32> to vector<16x32xf32>
    %30 = arith.addf %27, %29 : vector<16x32xf32>
    %31 = arith.truncf %30 : vector<16x32xf32> to vector<16x32xbf16>
    %c0_16 = arith.constant 0 : index
    %c0_17 = arith.constant 0 : index
    %32 = vector.load %arg7[%c0_16, %c0_17] : memref<16x32xbf16, #tpu.memory_space<vmem>>, vector<16x32xbf16>
    tpu.vector_store %arg7[%c0_16, %c0_17], %31 {strides = array<i32>} : memref<16x32xbf16, #tpu.memory_space<vmem>>, vector<16x32xbf16>,
    return
  }
  func.func @transform_0(%arg0: i32) -> (i32, i32) {
    %c0_i32 = arith.constant 0 : i32
    %c0_i32_0 = arith.constant 0 : i32
    return %arg0, %c0_i32 : i32, i32
  }
  func.func @transform_1(%arg0: i32) -> (i32, i32) {
    %c0_i32 = arith.constant 0 : i32
    %c0_i32_0 = arith.constant 0 : i32
    %c0_i32_1 = arith.constant 0 : i32
    return %c0_i32, %c0_i32_0 : i32, i32
  }
  func.func @transform_2(%arg0: i32) -> (i32, i32) {
    %c0_i32 = arith.constant 0 : i32
    %c0_i32_0 = arith.constant 0 : i32
    %c0_i32_1 = arith.constant 0 : i32
    return %c0_i32, %c0_i32_0 : i32, i32
  }
  func.func @transform_3(%arg0: i32) -> (i32, i32) {
    %c0_i32 = arith.constant 0 : i32
    %c0_i32_0 = arith.constant 0 : i32
    return %arg0, %c0_i32 : i32, i32
  }
  func.func @transform_4(%arg0: i32) -> (i32, i32) {
    %c0_i32 = arith.constant 0 : i32
    %c0_i32_0 = arith.constant 0 : i32
    %c0_i32_1 = arith.constant 0 : i32
    return %c0_i32, %c0_i32_0 : i32, i32
  }
  func.func @transform_5(%arg0: i32) -> (i32, i32) {
    %c0_i32 = arith.constant 0 : i32
    %c0_i32_0 = arith.constant 0 : i32
    %c0_i32_1 = arith.constant 0 : i32
    return %c0_i32, %c0_i32_0 : i32, i32
  }
  func.func @transform_6(%arg0: i32) -> (i32, i32) {
    %c0_i32 = arith.constant 0 : i32
    %c0_i32_0 = arith.constant 0 : i32
    return %arg0, %c0_i32 : i32, i32
  }
}

</mosaic_0001>

<bundles_post_ra>
// kernel: _encoder_forward.11
= control target key start
LH: loop header
LB: loop body
LE: loop exit
PB: predicated region body
PF: predicated region fallthrough
CT: control target
= control target key end

     0   :  { %vm16_vm0 = vcmask 261120   ;;  %v98_v4 = vmov 32.0   ;;  %vm82_vm6 = vcmask 257024   ;;  %s141_s0 = inlined_call_operand.vmem [shape: f32[16,32], index: 0, kind: input, shape index: {}]   ;;  %s142_s1 = inlined_call_operand.vmem [shape: f32[1,32], index: 1, kind: input, shape index: {}]   ;;  %s143_s2 = inlined_call_operand.vmem [shape: f32[1,32], index: 2, kind: input, shape index: {}]   ;;  %s144_s3 = inlined_call_operand.vmem [shape: bf16[16,32], index: 3, kind: output, shape index: {}]  }
   0x1   :  { %v14_v0 = vld [vmem:[%s141_s0] sm:$0xff]  ;;  %v15_v2 = vld [vmem:[%s141_s0 + $0x8] sm:$0xff]  ;;  %92 = vrcp.f32 %v98_v4 }
   0x2   :  { %v17_v1 = vsel %vm16_vm0, %v14_v0, 0.0  ;;  %v20_v3 = vsel %vm16_vm0, %v15_v2, 0.0  ;;  %v90_v35 = vld [vmem:[%s142_s1] ss:$0 sm:$0xff] }
   0x3   :  { %18 = vadd.xlane.f32.xlu0 %v17_v1  ;;  %v91_v38 = vld [vmem:[%s143_s2] ss:$0 sm:$0xff] }
   0x7   :  { %v93_v5 = vpop.eup %92 }
   0x8   :  { %v24_v6 = vmul.f32 32.0, %v93_v5  ;;  %vm28_vm1 = vweird.f32 %v93_v5 }
   0xa   :  { %v25_v7 = vsub.f32 1.0, %v24_v6 }
   0xb   :  { %21 = vadd.xlane.f32.xlu0 %v20_v3 }
   0xc   :  { %v26_v8 = vmul.f32 %v93_v5, %v25_v7 }
   0xe   :  { %v27_v9 = vadd.f32 %v93_v5, %v26_v8 }
  0x10   :  { %v29_v10 = vsel %vm28_vm1, %v93_v5, %v27_v9 }
  0x76   :  { %v19_v11 = vpop.xlane.xlu0 %18 }
  0x77   :  { %v30_v12 = vmul.f32 %v29_v10, %v19_v11 }
  0x79   :  { %v32_v13 = vsub.f32 %v14_v0, %v30_v12 }
  0x7b   :  { %v34_v14 = vmul.f32 %v32_v13, %v32_v13 }
  0x7d   :  { %v36_v15 = vsel %vm16_vm0, %v34_v14, 0.0 }
  0x7e   :  { %37 = vadd.xlane.f32.xlu1 %v36_v15  ;;  %v22_v16 = vpop.xlane.xlu0 %21 }
  0x7f   :  { %v31_v17 = vmul.f32 %v29_v10, %v22_v16 }
  0x81   :  { %v33_v18 = vsub.f32 %v15_v2, %v31_v17 }
  0x83   :  { %v35_v19 = vmul.f32 %v33_v18, %v33_v18 }
  0x85   :  { %v39_v20 = vsel %vm16_vm0, %v35_v19, 0.0 }
  0x86   :  { %40 = vadd.xlane.f32.xlu1 %v39_v20 }
  0xf1   :  { %v38_v21 = vpop.xlane.xlu1 %37 }
  0xf2   :  { %v42_v22 = vmul.f32 %v38_v21, %v29_v10 }
  0xf4   :  { %v44_v23 = vadd.f32 1e-05, %v42_v22 }
  0xf6   :  { %94 = vrsqrt.f32 %v44_v23  ;;  %vm52_vm3 = vweird.f32 %v44_v23 }
  0xf9   :  { %v41_v24 = vpop.xlane.xlu1 %40 }
  0xfa   :  { %v43_v25 = vmul.f32 %v41_v24, %v29_v10 }
  0xfc   :  { %v95_v26 = vpop.eup %94  ;;  %v45_v27 = vadd.f32 1e-05, %v43_v25 }
  0xfd   :  { %v47_v28 = vmul.f32 %v95_v26, %v44_v23  ;;  %vm53_vm2 = vweird.f32 %v95_v26 }
  0xfe   :  { %96 = vrsqrt.f32 %v45_v27  ;;  %vm54_vm4 = vmor %vm52_vm3, %vm53_vm2  ;;  %vm62_vm7 = vweird.f32 %v45_v27 }
  0xff   :  { %v48_v29 = vmul.f32 %v95_v26, %v47_v28 }
 0x101   :  { %v49_v30 = vmul.f32 0.5, %v48_v29 }
 0x103   :  { %v50_v31 = vsub.f32 1.5, %v49_v30 }
 0x104   :  { %v97_v32 = vpop.eup %96 }
 0x105   :  { %v51_v33 = vmul.f32 %v95_v26, %v50_v31  ;;  %v57_v34 = vmul.f32 %v97_v32, %v45_v27  ;;  %vm63_vm5 = vweird.f32 %v97_v32 }
 0x106   :  { %vm64_vm8 = vmor %vm62_vm7, %vm63_vm5 }
 0x107   :  { %v55_v36 = vsel %vm54_vm4, %v95_v26, %v51_v33  ;;  %v58_v37 = vmul.f32 %v97_v32, %v57_v34 }
 0x108   :  { %v66_v39 = vmul.f32 %v55_v36, %v32_v13 }
 0x109   :  { %v59_v40 = vmul.f32 0.5, %v58_v37 }
 0x10a   :  { %v72_v41 = vmul.f32 %v90_v35, %v66_v39 }
 0x10b   :  { %v60_v42 = vsub.f32 1.5, %v59_v40 }
 0x10c   :  { %v78_v43 = vadd.f32 %v91_v38, %v72_v41 }
 0x10d   :  { %v61_v44 = vmul.f32 %v97_v32, %v60_v42 }
 0x10e   :  { %v80_v45 = vpack.c.bf16 %v78_v43, %v78_v43 }
 0x10f   :  { %v65_v46 = vsel %vm64_vm8, %v97_v32, %v61_v44 }
 0x110   :  { %83 = vst.msk [vmem:[%s144_s3] sm:$0xf] %vm82_vm6, %v80_v45  ;;  %v67_v47 = vmul.f32 %v65_v46, %v33_v18 }
 0x112   :  { %v73_v48 = vmul.f32 %v90_v35, %v67_v47 }
 0x114   :  { %v79_v49 = vadd.f32 %v91_v38, %v73_v48 }
 0x116   :  { %v81_v50 = vpack.c.bf16 %v79_v49, %v79_v49 }
 0x118   :  { %84 = vst.msk [vmem:[%s144_s3 + $0x4] sm:$0xf] %vm82_vm6, %v81_v50 }

// kernel: _encoder_forward.12
= control target key start
LH: loop header
LB: loop body
LE: loop exit
PB: predicated region body
PF: predicated region fallthrough
CT: control target
= control target key end

     0   :  { %vm42_vm0 = vcmask 261120   ;;  %vm62_vm1 = vcmask 257024   ;;  %s113_s22 = smov 96   ;;  %s170_s1 = inlined_call_operand.vmem [shape: bf16[32,96], index: 1, kind: input, shape index: {}]   ;;  %s171_s2 = inlined_call_operand.vmem [shape: f32[1,96], index: 2, kind: input, shape index: {}]   ;;  %s172_s0 = inlined_call_operand.vmem [shape: bf16[16,32], index: 0, kind: input, shape index: {}]   ;;  %s173_s3 = inlined_call_operand.vmem [shape: bf16[3,16,32], index: 3, kind: output, shape index: {}]  }
   0x1   :  { %v108_v0 = vld [vmem:[%s170_s1 + $0x8] sm:$0xff]  ;;  %v107_v1 = vld [vmem:[%s170_s1] sm:$0xff]  ;;  %s112_s1 = smov 64  }
   0x2   :  { %52 = vmatpush.bf16.msra.mxu0 %v108_v0  ;;  %v106_v2 = vld [vmem:[%s172_s0] sm:$0xff] }
   0x3   :  { %v111_v3 = vld [vmem:[%s171_s2] ss:$0 sm:$0xff] }
   0x6   :  { %53 = vmatpush.bf16.msra.mxu0 %v107_v1 }
   0x9   :  { %101 = vmatmul.msk.bf16.vlgmr.msra.gmra.mxu0 %vm42_vm0, %v106_v2 }
  0x86   :  { %v55_v4 = vpop.f32.mrf.mxu0 }
  0x87   :  { %v56_v5 = vadd.f32 %v111_v3, %v55_v4 }
  0x89   :  { %v60_v6 = vpack.c.bf16 %v56_v5, %v56_v5 }
  0x8b   :  { %63 = vst.msk [vmem:[%s173_s3] sm:$0xf] %vm62_vm1, %v60_v6  ;;  %76 = vrot.lane.b32.xlu1 %v60_v6, %s112_s1  ;;  %67 = vrot.lane.b32.xlu0 %v60_v6, %s113_s22 }
  0x8e   :  { %v57_v7 = vpop.f32.mrf.mxu0 }
  0x8f   :  { %v58_v8 = vadd.f32 %v111_v3, %v57_v7 }
  0x91   :  { %v61_v9 = vpack.c.bf16 %v58_v8, %v58_v8 }
  0x93   :  { %64 = vst.msk [vmem:[%s173_s3 + $0x4] sm:$0xf] %vm62_vm1, %v61_v9  ;;  %78 = vrot.lane.b32.xlu1 %v61_v9, %s112_s1  ;;  %69 = vrot.lane.b32.xlu0 %v61_v9, %s113_s22 }
  0xfd   :  { %v77_v10 = vpop.permute.xlu1 %76  ;;  %v68_v11 = vpop.permute.xlu0 %67 }
  0xfe   :  { %104 = vst.msk [vmem:[%s173_s3 + $0x10] sm:$0xf] %vm62_vm1, %v77_v10 }
  0xff   :  { %102 = vst.msk [vmem:[%s173_s3 + $0x8] sm:$0xf] %vm62_vm1, %v68_v11 }
 0x105   :  { %v79_v12 = vpop.permute.xlu1 %78  ;;  %v70_v13 = vpop.permute.xlu0 %69 }
 0x106   :  { %105 = vst.msk [vmem:[%s173_s3 + $0x14] sm:$0xf] %vm62_vm1, %v79_v12 }
 0x107   :  { %103 = vst.msk [vmem:[%s173_s3 + $0xc] sm:$0xf] %vm62_vm1, %v70_v13 }

// kernel: _encoder_forward.14
= control target key start
LH: loop header
LB: loop body
LE: loop exit
PB: predicated region body
PF: predicated region fallthrough
CT: control target
= control target key end

     0   :  { %vm51_vm0 = vcmask 261120   ;;  %v177_v15 = vmov 32.0   ;;  %vm140_vm6 = vcmask 257024   ;;  %s245_s1 = inlined_call_operand.vmem [shape: bf16[32,32], index: 1, kind: input, shape index: {}]   ;;  %s246_s2 = inlined_call_operand.vmem [shape: f32[1,32], index: 2, kind: input, shape index: {}]   ;;  %s247_s0 = inlined_call_operand.vmem [shape: bf16[16,32], index: 0, kind: input, shape index: {}]   ;;  %s248_s3 = inlined_call_operand.vmem [shape: bf16[16,32], index: 3, kind: input, shape index: {}]   ;;  %s249_s4 = inlined_call_operand.vmem [shape: f32[1,32], index: 4, kind: input, shape index: {}]   ;;  %s250_s5 = inlined_call_operand.vmem [shape: f32[1,32], index: 5, kind: input, shape index: {}]   ;;  %s251_s6 = inlined_call_operand.vmem [shape: bf16[16,32], index: 6, kind: output, shape index: {}]  }
   0x1   :  { %v162_v0 = vld [vmem:[%s245_s1 + $0x8] sm:$0xff]  ;;  %v161_v1 = vld [vmem:[%s245_s1] sm:$0xff]  ;;  %171 = vrcp.f32 %v177_v15 }
   0x2   :  { %61 = vmatpush.bf16.msra.mxu0 %v162_v0  ;;  %v160_v2 = vld [vmem:[%s247_s0] sm:$0xff] }
   0x3   :  { %v164_v3 = vld [vmem:[%s248_s3] sm:$0xff]  }
   0x4   :  { %v168_v4 = vld [vmem:[%s246_s2] ss:$0 sm:$0xff]  ;;  %v165_v5 = vunpack.c.l.bf16 %v164_v3  ;;  %v166_v10 = vunpack.c.h.bf16 %v164_v3 }
   0x5   :  { %v169_v46 = vld [vmem:[%s249_s4] ss:$0 sm:$0xff] }
   0x6   :  { %62 = vmatpush.bf16.msra.mxu0 %v161_v1  ;;  %v170_v49 = vld [vmem:[%s250_s5] ss:$0 sm:$0xff] }
   0x7   :  { %v172_v16 = vpop.eup %171 }
   0x8   :  { %v82_v17 = vmul.f32 32.0, %v172_v16  ;;  %vm86_vm1 = vweird.f32 %v172_v16 }
   0x9   :  { %159 = vmatmul.msk.bf16.vlgmr.msra.gmra.mxu0 %vm51_vm0, %v160_v2 }
   0xa   :  { %v83_v18 = vsub.f32 1.0, %v82_v17 }
   0xc   :  { %v84_v19 = vmul.f32 %v172_v16, %v83_v18 }
   0xe   :  { %v85_v20 = vadd.f32 %v172_v16, %v84_v19 }
  0x10   :  { %v87_v21 = vsel %vm86_vm1, %v172_v16, %v85_v20 }
  0x86   :  { %v64_v6 = vpop.f32.mrf.mxu0 }
  0x87   :  { %v65_v7 = vadd.f32 %v168_v4, %v64_v6 }
  0x89   :  { %v73_v8 = vadd.f32 %v165_v5, %v65_v7 }
  0x8b   :  { %v75_v9 = vsel %vm51_vm0, %v73_v8, 0.0 }
  0x8c   :  { %76 = vadd.xlane.f32.xlu0 %v75_v9 }
  0x8e   :  { %v66_v11 = vpop.f32.mrf.mxu0 }
  0x8f   :  { %v67_v12 = vadd.f32 %v168_v4, %v66_v11 }
  0x91   :  { %v74_v13 = vadd.f32 %v166_v10, %v67_v12 }
  0x93   :  { %v78_v14 = vsel %vm51_vm0, %v74_v13, 0.0 }
  0x94   :  { %79 = vadd.xlane.f32.xlu0 %v78_v14 }
  0xff   :  { %v77_v22 = vpop.xlane.xlu0 %76 }
 0x100   :  { %v88_v23 = vmul.f32 %v87_v21, %v77_v22 }
 0x102   :  { %v90_v24 = vsub.f32 %v73_v8, %v88_v23 }
 0x104   :  { %v92_v25 = vmul.f32 %v90_v24, %v90_v24 }
 0x106   :  { %v94_v26 = vsel %vm51_vm0, %v92_v25, 0.0 }
 0x107   :  { %95 = vadd.xlane.f32.xlu1 %v94_v26  ;;  %v80_v27 = vpop.xlane.xlu0 %79 }
 0x108   :  { %v89_v28 = vmul.f32 %v87_v21, %v80_v27 }
 0x10a   :  { %v91_v29 = vsub.f32 %v74_v13, %v89_v28 }
 0x10c   :  { %v93_v30 = vmul.f32 %v91_v29, %v91_v29 }
 0x10e   :  { %v97_v31 = vsel %vm51_vm0, %v93_v30, 0.0 }
 0x10f   :  { %98 = vadd.xlane.f32.xlu1 %v97_v31 }
 0x17a   :  { %v96_v32 = vpop.xlane.xlu1 %95 }
 0x17b   :  { %v100_v33 = vmul.f32 %v96_v32, %v87_v21 }
 0x17d   :  { %v102_v34 = vadd.f32 1e-05, %v100_v33 }
 0x17f   :  { %173 = vrsqrt.f32 %v102_v34  ;;  %vm110_vm3 = vweird.f32 %v102_v34 }
 0x182   :  { %v99_v35 = vpop.xlane.xlu1 %98 }
 0x183   :  { %v101_v36 = vmul.f32 %v99_v35, %v87_v21 }
 0x185   :  { %v174_v37 = vpop.eup %173  ;;  %v103_v38 = vadd.f32 1e-05, %v101_v36 }
 0x186   :  { %v105_v39 = vmul.f32 %v174_v37, %v102_v34  ;;  %vm111_vm2 = vweird.f32 %v174_v37 }
 0x187   :  { %175 = vrsqrt.f32 %v103_v38  ;;  %vm112_vm4 = vmor %vm110_vm3, %vm111_vm2  ;;  %vm120_vm7 = vweird.f32 %v103_v38 }
 0x188   :  { %v106_v40 = vmul.f32 %v174_v37, %v105_v39 }
 0x18a   :  { %v107_v41 = vmul.f32 0.5, %v106_v40 }
 0x18c   :  { %v108_v42 = vsub.f32 1.5, %v107_v41 }
 0x18d   :  { %v176_v43 = vpop.eup %175 }
 0x18e   :  { %v109_v44 = vmul.f32 %v174_v37, %v108_v42  ;;  %v115_v45 = vmul.f32 %v176_v43, %v103_v38  ;;  %vm121_vm5 = vweird.f32 %v176_v43 }
 0x18f   :  { %vm122_vm8 = vmor %vm120_vm7, %vm121_vm5 }
 0x190   :  { %v113_v47 = vsel %vm112_vm4, %v174_v37, %v109_v44  ;;  %v116_v48 = vmul.f32 %v176_v43, %v115_v45 }
 0x191   :  { %v124_v50 = vmul.f32 %v113_v47, %v90_v24 }
 0x192   :  { %v117_v51 = vmul.f32 0.5, %v116_v48 }
 0x193   :  { %v130_v52 = vmul.f32 %v169_v46, %v124_v50 }
 0x194   :  { %v118_v53 = vsub.f32 1.5, %v117_v51 }
 0x195   :  { %v136_v54 = vadd.f32 %v170_v49, %v130_v52 }
 0x196   :  { %v119_v55 = vmul.f32 %v176_v43, %v118_v53 }
 0x197   :  { %v138_v56 = vpack.c.bf16 %v136_v54, %v136_v54 }
 0x198   :  { %v123_v57 = vsel %vm122_vm8, %v176_v43, %v119_v55 }
 0x199   :  { %141 = vst.msk [vmem:[%s251_s6] sm:$0xf] %vm140_vm6, %v138_v56  ;;  %v125_v58 = vmul.f32 %v123_v57, %v91_v29 }
 0x19b   :  { %v131_v59 = vmul.f32 %v169_v46, %v125_v58 }
 0x19d   :  { %v137_v60 = vadd.f32 %v170_v49, %v131_v59 }
 0x19f   :  { %v139_v61 = vpack.c.bf16 %v137_v60, %v137_v60 }
 0x1a1   :  { %142 = vst.msk [vmem:[%s251_s6 + $0x4] sm:$0xf] %vm140_vm6, %v139_v61 }

// kernel: _encoder_forward.13
= control target key start
LH: loop header
LB: loop body
LE: loop exit
PB: predicated region body
PF: predicated region fallthrough
CT: control target
= control target key end

     0   :  { %s906_s12 = smov 0   ;;  %s908_s13 = smov 0   ;;  %s1066_s0 = inlined_call_operand.vmem [shape: bf16[3,2,8,32], index: 0, kind: input, shape index: {}, may-alias: {0,1,2}]   ;;  %s1067_s1 = inlined_call_operand.vmem [shape: bf16[3,2,8,32], index: 1, kind: input, shape index: {}, may-alias: {0,1,2}]   ;;  %s1068_s2 = inlined_call_operand.vmem [shape: bf16[3,2,8,32], index: 2, kind: input, shape index: {}, may-alias: {0,1,2}]   ;;  %s1069_s3 = inlined_call_operand.vmem [shape: bf16[2,8,32], index: 3, kind: output, shape index: {}]  }
   0x1   :  { %s910_s14 = smov 0  }
   0x2 LB: > { %s32_s15 = sadd.s32 1, %s871_s13  ;;  %p776_p0 = scmp.ge.s32.totalorder %s875_s14, 1  ;;  %s875_s14 = sphi %s910_s14, %s13_s14   ;;  %s871_s13 = sphi %s908_s13, %s1071_s13   ;;  %s867_s12 = sphi %s906_s12, %s1070_s12  }
   0x3   : > { %p34_p1 = scmp.ge.s32.totalorder %s32_s15, 2  ;;  %p192_p2 = scmp.lt.s32.totalorder %s875_s14, 3 }
   0x5   : > { %s1073_s15 = smov (%p34_p1, %s32_s15), 0  ;;  %p193_p3 = pnand %p776_p0, %p192_p2 }
   0x6   : > { %p236_p4 = scmp.lt.s32.totalorder (!%p193_p3), %s867_s12, 1  ;;  %s877_s23 = smov (!%p193_p3), 120  }
   0x7   : > { %196 = sbr.rel (%p193_p3) target bundleno = 870 (0x366), region = 32  ;;  %s878_s24 = smov (!%p193_p3), 112  }
   0x8   : > { %s879_s25 = smov (!%p193_p3), 104   ;;  %s883_s29 = smov (!%p193_p3), 8  }
   0x9   : > { %s884_s30 = smov (!%p193_p3), 16   ;;  %s885_s4 = smov (!%p193_p3), 24  }
   0xc   : > { %s1075_s12 = smov (!%p236_p4, %s867_s12), 1  ;;  %vm280_vm0 = vcmask 64512   ;;  %vm271_vm1 = vcmask 7168   ;;  %v880_v16 = vmov -inf   ;;  %v881_v25 = vmov 0  }
   0xd   : > { %s924_s16 = sshll.u32 %s1075_s12, 2  ;;  %273 = vst.msk [vmem:[#allocation2 + $0x8] sm:$0xff] %vm271_vm1, %v880_v16  ;;  %828 = vset.pattern.permute.xlu1 %v881_v25  ;;  %826 = vset.pattern.permute.xlu2 %v881_v25  ;;  %v882_v30 = vmov 0.0   ;;  %vm514_vm2 = vcmask 1043456   ;;  %vm652_vm3 = vcmask 130048   ;;  %vm654_vm4 = vcmask 195584  }
   0xe   : > { %s714_s19 = scalar_lea.vmem %s1067_s1, %s924_s16  ;;  %s242_s22 = scalar_lea.vmem %s1066_s0, %s924_s16  ;;  %272 = vst.msk [vmem:[#allocation2] sm:$0xff] %vm271_vm1, %v880_v16  ;;  %827 = vset.pattern.permute.xlu0 %v881_v25  ;;  %vm657_vm5 = vcmask 257024  }
   0xf   : > { %v781_v0 = vld [vmem:[%s714_s19 + $0x8] sm:$0xf]  ;;  %v285_v1 = vld [vmem:[%s242_s22] sm:$0xf]  ;;  %274 = vst.msk [vmem:[#allocation2 + $0x10] sm:$0xff] %vm271_vm1, %v880_v16  ;;  %s718_s28 = scalar_lea.vmem %s1068_s2, %s924_s16  ;;  %s265_s7 = scalar_lea.vmem %s1069_s3, %s924_s16 }
  0x10   : > { %295 = vrot.lane.b32.xlu2 %v781_v0, %s877_s23  ;;  %297 = vrot.lane.b32.xlu0 %v781_v0, %s878_s24  ;;  %v314_v5 = vsel %vm280_vm0, %v781_v0, 0  ;;  %275 = vst.msk [vmem:[#allocation2 + $0x18] sm:$0xff] %vm271_vm1, %v880_v16  ;;  %v782_v31 = vld [vmem:[%s718_s28 + $0x10] sm:$0xf] }
  0x11   : > { %289 = vrot.lane.b32.xlu1 %v285_v1, %s878_s24  ;;  %323 = vmatpush.bf16.xpose.msra.mxu0 %v314_v5  ;;  %277 = vst.msk [vmem:[#allocation3 + $0x8] sm:$0xff] %vm271_vm1, %v882_v30  ;;  %v516_v50 = vsel %vm514_vm2, %v782_v31, 0 }
  0x12   : > { %276 = vst.msk [vmem:[#allocation3] sm:$0xff] %vm271_vm1, %v882_v30 }
  0x13   : > { %278 = vst.msk [vmem:[#allocation3 + $0x10] sm:$0xff] %vm271_vm1, %v882_v30 }
  0x14   : > { %v965_v26 = vld [vmem:[#allocation2 + $0x8] sm:$0xff]  ;;  %279 = vst.msk [vmem:[#allocation3 + $0x18] sm:$0xff] %vm271_vm1, %v882_v30 }
  0x15   : > { %281 = vst.msk [vmem:[#allocation4] sm:$0xff] %vm280_vm0, %v882_v30  ;;  %v1009_v40 = vld [vmem:[#allocation2] sm:$0xff] }
  0x16   : > { %282 = vst.msk [vmem:[#allocation4 + $0x8] sm:$0xff] %vm280_vm0, %v882_v30  ;;  %v988_v32 = vld [vmem:[#allocation2 + $0x10] sm:$0xff] }
  0x17   : > { %283 = vst.msk [vmem:[#allocation4 + $0x10] sm:$0xff] %vm280_vm0, %v882_v30  ;;  %v998_v36 = vld [vmem:[#allocation2 + $0x18] sm:$0xff] }
  0x18   : > { %299 = vrot.lane.b32.xlu0 %v781_v0, %s879_s25  ;;  %287 = vrot.lane.b32.xlu2 %v285_v1, %s877_s23  ;;  %284 = vst.msk [vmem:[#allocation4 + $0x18] sm:$0xff] %vm280_vm0, %v882_v30 }
  0x19   : > { %291 = vrot.lane.b32.xlu1 %v285_v1, %s879_s25  ;;  %783 = vmatmul.msk.bf16.vlgmr.msra.gmra.mxu0 %vm280_vm0, %v285_v1 }
  0x1a   : > { %525 = vmatpush.bf16.msrb.mxu0 %v516_v50 }
  0x6a   : > { %v296_v2 = vpop.permute.xlu2 %295 }
  0x6b   : > { %v333_v3 = vsel %vm280_vm0, %v296_v2, 0 }
  0x6c   : > { %342 = vmatpush.bf16.xpose.msra.mxu1 %v333_v3 }
  0x72   : > { %v288_v4 = vpop.permute.xlu2 %287 }
  0x73   : > { %784 = vmatmul.msk.bf16.vlgmr.msra.gmra.mxu1 %vm280_vm0, %v288_v4 }
  0x82   : > { %v298_v6 = vpop.permute.xlu0 %297 }
  0x83   : > { %v352_v7 = vsel %vm280_vm0, %v298_v6, 0  ;;  %v290_v8 = vpop.permute.xlu1 %289 }
  0x84   : > { %361 = vmatpush.bf16.xpose.msra.mxu2 %v352_v7 }
  0x8a   : > { %v300_v9 = vpop.permute.xlu0 %299 }
  0x8b   : > { %785 = vmatmul.msk.bf16.vlgmr.msra.gmra.mxu2 %vm280_vm0, %v290_v8  ;;  %v371_v10 = vsel %vm280_vm0, %v300_v9, 0  ;;  %v292_v11 = vpop.permute.xlu1 %291 }
  0x8c   : > { %380 = vmatpush.bf16.xpose.msra.mxu3 %v371_v10 }
  0x93   : > { %786 = vmatmul.msk.bf16.vlgmr.msra.gmra.mxu3 %vm280_vm0, %v292_v11 }
  0x96   : > { %v952_v15 = vpop.f32.mrf.mxu0 }
  0x97   : > { %v390_v23 = vsel %vm280_vm0, %v952_v15, -inf }
  0x9e   : > { %v327_v17 = vpop.f32.mrf.mxu0 }
  0x9f   : > { %v451_v17 = vld [vmem:[#allocation3 + $0x8] sm:$0xff] }
  0xf0   : > { %v948_v12 = vpop.f32.mrf.mxu1 }
  0xf1   : > { %v393_v13 = vsel %vm280_vm0, %v948_v12, -inf }
  0xf2   : > { %394 = vmax.xlane.f32.xlu2 %v393_v13 }
  0xf8   : > { %v346_v14 = vpop.f32.mrf.mxu1 }
 0x10e   : > { %v363_v18 = vpop.f32.mrf.mxu2 }
 0x10f   : > { %v396_v19 = vsel %vm280_vm0, %v363_v18, -inf }
 0x110   : > { %397 = vmax.xlane.f32.xlu0 %v396_v19 }
 0x116   : > { %v365_v20 = vpop.f32.mrf.mxu2  ;;  %v959_v21 = vpop.f32.mrf.mxu3 }
 0x117   : > { %v399_v22 = vsel %vm280_vm0, %v959_v21, -inf }
 0x118   : > { %400 = vmax.xlane.f32.xlu1 %v399_v22 }
 0x11e   : > { %v384_v24 = vpop.f32.mrf.mxu3 }
 0x120   : > { %391 = vmax.xlane.f32.xlu1 %v390_v23 }
 0x165   : > { %v395_v27 = vpop.xlane.xlu2 %394 }
 0x166   : > { %v968_v28 = vmax.f32 %v965_v26, %v395_v27 }
 0x168   : > { %v407_v29 = vsub.f32 %v965_v26, %v968_v28  ;;  %597 = vst.msk [vmem:[#allocation2 + $0x8] sm:$0xff] %vm271_vm1, %v968_v28  ;;  %425 = vperm.xlu1 %828, %v968_v28  }
 0x16a   : > { %v412_v1 = vmul.f32 1.442695, %v407_v29 }
 0x170   : > { %303 = vrot.lane.b32.xlu1 %v782_v31, %s877_s23 }
 0x183   : > { %v398_v33 = vpop.xlane.xlu0 %397 }
 0x184   : > { %v991_v34 = vmax.f32 %v988_v32, %v398_v33 }
 0x186   : > { %v408_v35 = vsub.f32 %v988_v32, %v991_v34  ;;  %598 = vst.msk [vmem:[#allocation2 + $0x10] sm:$0xff] %vm271_vm1, %v991_v34  ;;  %430 = vperm.xlu2 %826, %v991_v34   ;;  %v450_v34 = vld [vmem:[#allocation3] sm:$0xff] }
 0x18b   : > { %v401_v37 = vpop.xlane.xlu1 %400 }
 0x18c   : > { %v1001_v38 = vmax.f32 %v998_v36, %v401_v37 }
 0x18e   : > { %v409_v39 = vsub.f32 %v998_v36, %v1001_v38  ;;  %599 = vst.msk [vmem:[#allocation2 + $0x18] sm:$0xff] %vm271_vm1, %v1001_v38  ;;  %305 = vrot.lane.b32.xlu2 %v782_v31, %s878_s24  ;;  %435 = vperm.xlu0 %827, %v1001_v38  }
 0x190   : > { %v416_v13 = vmul.f32 1.442695, %v409_v39 }
 0x193   : > { %v392_v41 = vpop.xlane.xlu1 %391 }
 0x194   : > { %v1012_v42 = vmax.f32 %v1009_v40, %v392_v41 }
 0x196   : > { %307 = vrot.lane.b32.xlu2 %v782_v31, %s879_s25  ;;  %v406_v43 = vsub.f32 %v1009_v40, %v1012_v42  ;;  %596 = vst.msk [vmem:[#allocation2] sm:$0xff] %vm271_vm1, %v1012_v42 }
 0x198   : > { %v410_v27 = vmul.f32 1.442695, %v406_v43  ;;  %v453_v43 = vld [vmem:[#allocation3 + $0x18] sm:$0xff] }
 0x19e   : > { %420 = vperm.xlu2 %826, %v1012_v42  }
 0x1da   : > { %v426_v44 = vpop.permute.xlu1 %425 }
 0x1db   : > { %v439_v45 = vsub.f32 %v948_v12, %v426_v44 }
 0x1dd   : > { %v444_v46 = vmul.f32 1.442695, %v439_v45 }
 0x1df   : > { %829 = vpow2.f32 %v444_v46 }
 0x1e0   : > { %v431_v47 = vpop.permute.xlu2 %430 }
 0x1e1   : > { %v440_v48 = vsub.f32 %v363_v18, %v431_v47 }
 0x1e2   : > { %v304_v49 = vpop.permute.xlu1 %303 }
 0x1e3   : > { %v446_v51 = vmul.f32 1.442695, %v440_v48  ;;  %v535_v52 = vsel %vm514_vm2, %v304_v49, 0  ;;  %v481_v49 = vld [vmem:[#allocation4 + $0x10] sm:$0xff] }
 0x1e4   : > { %544 = vmatpush.bf16.msrb.mxu1 %v535_v52 }
 0x1e5   : > { %v830_v53 = vpop.eup %829  ;;  %831 = vpow2.f32 %v446_v51 }
 0x1e6   : > { %v461_v54 = vsel %vm280_vm0, %v830_v53, 0.0  ;;  %v508_v55 = vpack.c.bf16 %v830_v53, %v830_v53 }
 0x1e7   : > { %462 = vadd.xlane.f32.xlu0 %v461_v54 }
 0x1e8   : > { %v306_v56 = vpop.permute.xlu2 %305  ;;  %788 = vmatmul.msk.bf16.vlgmr.msrb.gmra.mxu1 %vm280_vm0, %v508_v55 }
 0x1e9   : > { %v554_v57 = vsel %vm514_vm2, %v306_v56, 0  ;;  %v482_v56 = vld [vmem:[#allocation4 + $0x18] sm:$0xff] }
 0x1ea   : > { %563 = vmatpush.bf16.msrb.mxu2 %v554_v57 }
 0x1eb   : > { %v832_v58 = vpop.eup %831 }
 0x1ec   : > { %v464_v59 = vsel %vm280_vm0, %v832_v58, 0.0  ;;  %v509_v60 = vpack.c.bf16 %v832_v58, %v832_v58 }
 0x1ed   : > { %465 = vadd.xlane.f32.xlu1 %v464_v59 }
 0x1ee   : > { %789 = vmatmul.msk.bf16.vlgmr.msrb.gmra.mxu2 %vm280_vm0, %v509_v60 }
 0x1f0   : > { %v308_v61 = vpop.permute.xlu2 %307 }
 0x1f1   : > { %v573_v62 = vsel %vm514_vm2, %v308_v61, 0 }
 0x1f2   : > { %582 = vmatpush.bf16.msrb.mxu3 %v573_v62 }
 0x1f8   : > { %v421_v63 = vpop.permute.xlu2 %420 }
 0x1f9   : > { %v438_v0 = vsub.f32 %v952_v15, %v421_v63  ;;  %v414_v15 = vmul.f32 1.442695, %v408_v35  ;;  %v480_v35 = vld [vmem:[#allocation4 + $0x8] sm:$0xff] }
 0x1fb   : > { %v442_v2 = vmul.f32 1.442695, %v438_v0 }
 0x1fd   : > { %833 = vpow2.f32 %v442_v2 }
 0x1fe   : > { %835 = vpow2.f32 %v412_v1 }
 0x200   : > { %v436_v3 = vpop.permute.xlu0 %435 }
 0x201   : > { %v441_v4 = vsub.f32 %v959_v21, %v436_v3  ;;  %v452_v21 = vld [vmem:[#allocation3 + $0x10] sm:$0xff] }
 0x203   : > { %v834_v5 = vpop.eup %833  ;;  %v448_v6 = vmul.f32 1.442695, %v441_v4  ;;  %v479_v4 = vld [vmem:[#allocation4] sm:$0xff] }
 0x204   : > { %v458_v7 = vsel %vm280_vm0, %v834_v5, 0.0  ;;  %v507_v8 = vpack.c.bf16 %v834_v5, %v834_v5  ;;  %v836_v9 = vpop.eup %835 }
 0x205   : > { %837 = vpow2.f32 %v448_v6  ;;  %459 = vadd.xlane.f32.xlu0 %v458_v7  ;;  %v455_v18 = vmul.f32 %v836_v9, %v451_v17 }
 0x206   : > { %490 = vperm.xlu1 %828, %v836_v9   ;;  %787 = vmatmul.msk.bf16.vlgmr.msrb.gmra.mxu0 %vm280_vm0, %v507_v8  ;;  %839 = vpow2.f32 %v416_v13 }
 0x207   : > { %841 = vpow2.f32 %v414_v15 }
 0x20b   : > { %v838_v10 = vpop.eup %837 }
 0x20c   : > { %v467_v11 = vsel %vm280_vm0, %v838_v10, 0.0  ;;  %v510_v12 = vpack.c.bf16 %v838_v10, %v838_v10  ;;  %v840_v14 = vpop.eup %839 }
 0x20d   : > { %468 = vadd.xlane.f32.xlu2 %v467_v11  ;;  %v842_v16 = vpop.eup %841  ;;  %v457_v44 = vmul.f32 %v840_v14, %v453_v43 }
 0x20e   : > { %790 = vmatmul.msk.bf16.vlgmr.msrb.gmra.mxu3 %vm280_vm0, %v510_v12  ;;  %v456_v22 = vmul.f32 %v842_v16, %v452_v21 }
 0x219   : > { %500 = vperm.xlu0 %827, %v840_v14  }
 0x225   : > { %495 = vperm.xlu2 %826, %v842_v16  }
 0x25a   : > { %v463_v19 = vpop.xlane.xlu0 %462 }
 0x25b   : > { %v471_v20 = vadd.f32 %v463_v19, %v455_v18 }
 0x25d   : > { %476 = vst.msk [vmem:[#allocation3 + $0x8] sm:$0xff] %vm271_vm1, %v471_v20 }
 0x260   : > { %v466_v23 = vpop.xlane.xlu1 %465 }
 0x261   : > { %v472_v24 = vadd.f32 %v466_v23, %v456_v22 }
 0x263   : > { %477 = vst.msk [vmem:[#allocation3 + $0x10] sm:$0xff] %vm271_vm1, %v472_v24 }
 0x264   : > { %v608_v25 = vld [vmem:[#allocation3 + $0x8] sm:$0xff] }
 0x265   : > { %v546_v26 = vpop.f32.mrf.mxu1  ;;  %843 = vrcp.f32 %v608_v25 }
 0x26a   : > { %v609_v28 = vld [vmem:[#allocation3 + $0x10] sm:$0xff] }
 0x26b   : > { %v844_v29 = vpop.eup %843  ;;  %845 = vrcp.f32 %v609_v28 }
 0x26c   : > { %622 = vperm.xlu1 %828, %v844_v29   ;;  %847 = vpow2.f32 %v410_v27 }
 0x26d   : > { %v548_v30 = vpop.f32.mrf.mxu1 }
 0x271   : > { %v846_v31 = vpop.eup %845  ;;  %v565_v32 = vpop.f32.mrf.mxu2 }
 0x272   : > { %627 = vperm.xlu0 %827, %v846_v31   ;;  %v848_v33 = vpop.eup %847 }
 0x273   : > { %v454_v36 = vmul.f32 %v848_v33, %v450_v34 }
 0x274   : > { %485 = vperm.xlu1 %828, %v848_v33  }
 0x278   : > { %v460_v37 = vpop.xlane.xlu0 %459  ;;  %v491_v38 = vpop.permute.xlu1 %490 }
 0x279   : > { %v470_v39 = vadd.f32 %v460_v37, %v454_v36  ;;  %v504_v41 = vmul.f32 %v491_v38, %v480_v35  ;;  %v567_v40 = vpop.f32.mrf.mxu2 }
 0x27b   : > { %475 = vst.msk [vmem:[#allocation3] sm:$0xff] %vm271_vm1, %v470_v39  ;;  %v589_v42 = vadd.f32 %v546_v26, %v504_v41 }
 0x27d   : > { %593 = vst.msk [vmem:[#allocation4 + $0x8] sm:$0xff] %vm280_vm0, %v589_v42 }
 0x280   : > { %v469_v45 = vpop.xlane.xlu2 %468 }
 0x281   : > { %v473_v46 = vadd.f32 %v469_v45, %v457_v44 }
 0x282   : > { %v607_v47 = vld [vmem:[#allocation3] sm:$0xff] }
 0x283   : > { %478 = vst.msk [vmem:[#allocation3 + $0x18] sm:$0xff] %vm271_vm1, %v473_v46  ;;  %v527_v48 = vpop.f32.mrf.mxu0  ;;  %849 = vrcp.f32 %v607_v47 }
 0x284   : > { %v604_v63 = vld [vmem:[#allocation4 + $0x8] sm:$0xff] }
 0x288   : > { %v496_v50 = vpop.permute.xlu2 %495 }
 0x289   : > { %v850_v51 = vpop.eup %849  ;;  %v505_v52 = vmul.f32 %v496_v50, %v481_v49 }
 0x28a   : > { %617 = vperm.xlu0 %827, %v850_v51   ;;  %v610_v53 = vld [vmem:[#allocation3 + $0x18] sm:$0xff] }
 0x28b   : > { %v590_v54 = vadd.f32 %v565_v32, %v505_v52  ;;  %v529_v55 = vpop.f32.mrf.mxu0  ;;  %851 = vrcp.f32 %v610_v53  ;;  %v501_v57 = vpop.permute.xlu0 %500 }
 0x28c   : > { %v506_v58 = vmul.f32 %v501_v57, %v482_v56 }
 0x28d   : > { %594 = vst.msk [vmem:[#allocation4 + $0x10] sm:$0xff] %vm280_vm0, %v590_v54 }
 0x291   : > { %v852_v59 = vpop.eup %851  ;;  %v584_v60 = vpop.f32.mrf.mxu3 }
 0x292   : > { %v591_v61 = vadd.f32 %v584_v60, %v506_v58  ;;  %632 = vperm.xlu2 %826, %v852_v59  }
 0x294   : > { %595 = vst.msk [vmem:[#allocation4 + $0x18] sm:$0xff] %vm280_vm0, %v591_v61  ;;  %v605_v2 = vld [vmem:[#allocation4 + $0x10] sm:$0xff] }
 0x299   : > { %v586_v62 = vpop.f32.mrf.mxu3 }
 0x29b   : > { %v606_v10 = vld [vmem:[#allocation4 + $0x18] sm:$0xff] }
 0x2de   : > { %v623_v0 = vpop.permute.xlu1 %622 }
 0x2df   : > { %v636_v1 = vmul.f32 %v623_v0, %v604_v63 }
 0x2e1   : > { %640 = vrot.lane.b32.xlu2 %v636_v1, %s883_s29 }
 0x2e4   : > { %v628_v3 = vpop.permute.xlu0 %627 }
 0x2e5   : > { %v637_v5 = vmul.f32 %v628_v3, %v605_v2 }
 0x2e6   : > { %v486_v6 = vpop.permute.xlu1 %485 }
 0x2e7   : > { %v503_v7 = vmul.f32 %v486_v6, %v479_v4  ;;  %644 = vrot.lane.b32.xlu1 %v637_v5, %s884_s30 }
 0x2e9   : > { %v588_v8 = vadd.f32 %v527_v48, %v503_v7 }
 0x2eb   : > { %592 = vst.msk [vmem:[#allocation4] sm:$0xff] %vm280_vm0, %v588_v8 }
 0x2ec   : > { %v633_v9 = vpop.permute.xlu2 %632 }
 0x2ed   : > { %v638_v11 = vmul.f32 %v633_v9, %v606_v10 }
 0x2ef   : > { %648 = vrot.lane.b32.xlu0 %v638_v11, %s885_s4 }
 0x2f2   : > { %v603_v13 = vld [vmem:[#allocation4] sm:$0xff] }
 0x2fc   : > { %v618_v12 = vpop.permute.xlu0 %617 }
 0x2fd   : > { %v635_v15 = vmul.f32 %v618_v12, %v603_v13 }
 0x33b   : > { %v641_v14 = vpop.permute.xlu2 %640 }
 0x33c   : > { %v651_v17 = vsel %vm280_vm0, %v635_v15, %v641_v14 }
 0x359   : > { %v645_v16 = vpop.permute.xlu1 %644 }
 0x35a   : > { %v653_v18 = vsel %vm652_vm3, %v651_v17, %v645_v16 }
 0x361   : > { %v649_v19 = vpop.permute.xlu0 %648 }
 0x362   : > { %v655_v20 = vsel %vm654_vm4, %v653_v18, %v649_v19 }
 0x363   : > { %v656_v21 = vpack.c.bf16 %v655_v20, %v655_v20 }
 0x365   : > { %658 = vst.msk [vmem:[%s265_s7] sm:$0xf] %vm657_vm5, %v656_v21 }
 0x366 PF: > { %s13_s14 = sadd.s32 1, %s875_s14   ;;  %s1070_s12 = smov %s871_s13 }
 0x367   : > { %p10_p5 = scmp.ge.s32.totalorder %s13_s14, 4   ;;  %s1071_s13 = smov %s1073_s15 }
 0x369   :  { %12 = sbr.rel (!%p10_p5) target bundleno = 2 (0x2), region = 76 }

// kernel: _encoder_forward.15
= control target key start
LH: loop header
LB: loop body
LE: loop exit
PB: predicated region body
PF: predicated region fallthrough
CT: control target
= control target key end

     0   :  { %vm42_vm0 = vcmask 261120   ;;  %vm80_vm1 = vcmask 519168   ;;  %s146_s1 = inlined_call_operand.vmem [shape: bf16[32,64], index: 1, kind: input, shape index: {}]   ;;  %s147_s2 = inlined_call_operand.vmem [shape: f32[1,64], index: 2, kind: input, shape index: {}]   ;;  %s148_s0 = inlined_call_operand.vmem [shape: bf16[16,32], index: 0, kind: input, shape index: {}]   ;;  %s149_s3 = inlined_call_operand.vmem [shape: bf16[16,64], index: 3, kind: output, shape index: {}]  }
   0x1   :  { %v102_v0 = vld [vmem:[%s146_s1 + $0x8] sm:$0xff]  ;;  %v101_v1 = vld [vmem:[%s146_s1] sm:$0xff] }
   0x2   :  { %52 = vmatpush.bf16.msra.mxu0 %v102_v0  ;;  %v100_v2 = vld [vmem:[%s148_s0] sm:$0xff] }
   0x3   :  { %v103_v3 = vld [vmem:[%s147_s2] ss:$0 sm:$0xff] }
   0x6   :  { %53 = vmatpush.bf16.msra.mxu0 %v101_v1 }
   0x9   :  { %99 = vmatmul.msk.bf16.vlgmr.msra.gmra.mxu0 %vm42_vm0, %v100_v2 }
  0x86   :  { %v55_v4 = vpop.f32.mrf.mxu0 }
  0x87   :  { %v56_v5 = vadd.f32 %v103_v3, %v55_v4 }
  0x89   :  { %v62_v6 = vmul.f32 0.044715, %v56_v5  ;;  %v60_v19 = vmul.f32 0.5, %v56_v5 }
  0x8b   :  { %v64_v7 = vmul.f32 %v62_v6, %v56_v5 }
  0x8d   :  { %v66_v8 = vmul.f32 %v64_v7, %v56_v5 }
  0x8e   :  { %v57_v9 = vpop.f32.mrf.mxu0 }
  0x8f   :  { %v68_v10 = vadd.f32 %v66_v8, %v56_v5  ;;  %v58_v11 = vadd.f32 %v103_v3, %v57_v9 }
  0x91   :  { %v70_v12 = vmul.f32 0.7978846, %v68_v10  ;;  %v63_v13 = vmul.f32 0.044715, %v58_v11  ;;  %v61_v24 = vmul.f32 0.5, %v58_v11 }
  0x93   :  { %104 = vtanh.f32 %v70_v12  ;;  %v65_v14 = vmul.f32 %v63_v13, %v58_v11 }
  0x95   :  { %v67_v15 = vmul.f32 %v65_v14, %v58_v11 }
  0x97   :  { %v69_v16 = vadd.f32 %v67_v15, %v58_v11 }
  0x99   :  { %v105_v17 = vpop.eup %104  ;;  %v71_v18 = vmul.f32 0.7978846, %v69_v16 }
  0x9a   :  { %v74_v20 = vadd.f32 1.0, %v105_v17 }
  0x9b   :  { %106 = vtanh.f32 %v71_v18 }
  0x9c   :  { %v76_v21 = vmul.f32 %v74_v20, %v60_v19 }
  0x9e   :  { %v78_v22 = vpack.c.bf16 %v76_v21, %v76_v21 }
  0xa0   :  { %81 = vst.msk [vmem:[%s149_s3] sm:$0xf] %vm80_vm1, %v78_v22 }
  0xa1   :  { %v107_v23 = vpop.eup %106 }
  0xa2   :  { %v75_v25 = vadd.f32 1.0, %v107_v23 }
  0xa4   :  { %v77_v26 = vmul.f32 %v75_v25, %v61_v24 }
  0xa6   :  { %v79_v27 = vpack.c.bf16 %v77_v26, %v77_v26 }
  0xa8   :  { %82 = vst.msk [vmem:[%s149_s3 + $0x4] sm:$0xf] %vm80_vm1, %v79_v27 }

// kernel: _encoder_forward.16
= control target key start
LH: loop header
LB: loop body
LE: loop exit
PB: predicated region body
PF: predicated region fallthrough
CT: control target
= control target key end

     0   :  { %vm67_vm0 = vcmask 523264   ;;  %vm91_vm1 = vcmask 261120   ;;  %v204_v17 = vmov 32.0   ;;  %vm157_vm7 = vcmask 257024   ;;  %s277_s1 = inlined_call_operand.vmem [shape: bf16[64,32], index: 1, kind: input, shape index: {}]   ;;  %s278_s2 = inlined_call_operand.vmem [shape: f32[1,32], index: 2, kind: input, shape index: {}]   ;;  %s279_s0 = inlined_call_operand.vmem [shape: bf16[16,64], index: 0, kind: input, shape index: {}]   ;;  %s280_s3 = inlined_call_operand.vmem [shape: bf16[16,32], index: 3, kind: input, shape index: {}]   ;;  %s281_s4 = inlined_call_operand.vmem [shape: f32[1,32], index: 4, kind: input, shape index: {}]   ;;  %s282_s5 = inlined_call_operand.vmem [shape: f32[1,32], index: 5, kind: input, shape index: {}]   ;;  %s283_s6 = inlined_call_operand.vmem [shape: bf16[16,32], index: 6, kind: output, shape index: {}]  }
   0x1   :  { %v189_v0 = vld [vmem:[%s277_s1 + $0x18] sm:$0xff]  ;;  %v188_v1 = vld [vmem:[%s277_s1 + $0x10] sm:$0xff]  ;;  %v187_v2 = vld [vmem:[%s277_s1 + $0x8] sm:$0xff]  ;;  %198 = vrcp.f32 %v204_v17 }
   0x2   :  { %75 = vmatpush.bf16.msra.mxu0 %v189_v0  ;;  %v186_v3 = vld [vmem:[%s277_s1] sm:$0xff] }
   0x3   :  { %v185_v4 = vld [vmem:[%s279_s0] sm:$0xff] }
   0x4   :  { %v191_v5 = vld [vmem:[%s280_s3] sm:$0xff]  }
   0x5   :  { %v195_v6 = vld [vmem:[%s278_s2] ss:$0 sm:$0xff]  ;;  %v192_v7 = vunpack.c.l.bf16 %v191_v5  ;;  %v193_v12 = vunpack.c.h.bf16 %v191_v5 }
   0x6   :  { %76 = vmatpush.bf16.msra.mxu0 %v188_v1  ;;  %v196_v48 = vld [vmem:[%s281_s4] ss:$0 sm:$0xff] }
   0x7   :  { %v199_v18 = vpop.eup %198  ;;  %v197_v51 = vld [vmem:[%s282_s5] ss:$0 sm:$0xff] }
   0x8   :  { %v99_v19 = vmul.f32 32.0, %v199_v18  ;;  %vm103_vm2 = vweird.f32 %v199_v18 }
   0xa   :  { %77 = vmatpush.bf16.msra.mxu0 %v187_v2  ;;  %v100_v20 = vsub.f32 1.0, %v99_v19 }
   0xc   :  { %v101_v21 = vmul.f32 %v199_v18, %v100_v20 }
   0xe   :  { %78 = vmatpush.bf16.msra.mxu0 %v186_v3  ;;  %v102_v22 = vadd.f32 %v199_v18, %v101_v21 }
  0x10   :  { %v104_v23 = vsel %vm103_vm2, %v199_v18, %v102_v22 }
  0x11   :  { %184 = vmatmul.msk.bf16.vlgmr.msra.gmra.mxu0 %vm67_vm0, %v185_v4 }
  0x8e   :  { %v80_v8 = vpop.f32.mrf.mxu0 }
  0x8f   :  { %v81_v9 = vadd.f32 %v195_v6, %v80_v8 }
  0x91   :  { %v89_v10 = vadd.f32 %v192_v7, %v81_v9 }
  0x93   :  { %v92_v11 = vsel %vm91_vm1, %v89_v10, 0.0 }
  0x94   :  { %93 = vadd.xlane.f32.xlu0 %v92_v11 }
  0x96   :  { %v82_v13 = vpop.f32.mrf.mxu0 }
  0x97   :  { %v83_v14 = vadd.f32 %v195_v6, %v82_v13 }
  0x99   :  { %v90_v15 = vadd.f32 %v193_v12, %v83_v14 }
  0x9b   :  { %v95_v16 = vsel %vm91_vm1, %v90_v15, 0.0 }
  0x9c   :  { %96 = vadd.xlane.f32.xlu0 %v95_v16 }
 0x107   :  { %v94_v24 = vpop.xlane.xlu0 %93 }
 0x108   :  { %v105_v25 = vmul.f32 %v104_v23, %v94_v24 }
 0x10a   :  { %v107_v26 = vsub.f32 %v89_v10, %v105_v25 }
 0x10c   :  { %v109_v27 = vmul.f32 %v107_v26, %v107_v26 }
 0x10e   :  { %v111_v28 = vsel %vm91_vm1, %v109_v27, 0.0 }
 0x10f   :  { %112 = vadd.xlane.f32.xlu1 %v111_v28  ;;  %v97_v29 = vpop.xlane.xlu0 %96 }
 0x110   :  { %v106_v30 = vmul.f32 %v104_v23, %v97_v29 }
 0x112   :  { %v108_v31 = vsub.f32 %v90_v15, %v106_v30 }
 0x114   :  { %v110_v32 = vmul.f32 %v108_v31, %v108_v31 }
 0x116   :  { %v114_v33 = vsel %vm91_vm1, %v110_v32, 0.0 }
 0x117   :  { %115 = vadd.xlane.f32.xlu1 %v114_v33 }
 0x182   :  { %v113_v34 = vpop.xlane.xlu1 %112 }
 0x183   :  { %v117_v35 = vmul.f32 %v113_v34, %v104_v23 }
 0x185   :  { %v119_v36 = vadd.f32 1e-05, %v117_v35 }
 0x187   :  { %200 = vrsqrt.f32 %v119_v36  ;;  %vm127_vm4 = vweird.f32 %v119_v36 }
 0x18a   :  { %v116_v37 = vpop.xlane.xlu1 %115 }
 0x18b   :  { %v118_v38 = vmul.f32 %v116_v37, %v104_v23 }
 0x18d   :  { %v201_v39 = vpop.eup %200  ;;  %v120_v40 = vadd.f32 1e-05, %v118_v38 }
 0x18e   :  { %v122_v41 = vmul.f32 %v201_v39, %v119_v36  ;;  %vm128_vm3 = vweird.f32 %v201_v39 }
 0x18f   :  { %202 = vrsqrt.f32 %v120_v40  ;;  %vm129_vm5 = vmor %vm127_vm4, %vm128_vm3  ;;  %vm137_vm8 = vweird.f32 %v120_v40 }
 0x190   :  { %v123_v42 = vmul.f32 %v201_v39, %v122_v41 }
 0x192   :  { %v124_v43 = vmul.f32 0.5, %v123_v42 }
 0x194   :  { %v125_v44 = vsub.f32 1.5, %v124_v43 }
 0x195   :  { %v203_v45 = vpop.eup %202 }
 0x196   :  { %v126_v46 = vmul.f32 %v201_v39, %v125_v44  ;;  %v132_v47 = vmul.f32 %v203_v45, %v120_v40  ;;  %vm138_vm6 = vweird.f32 %v203_v45 }
 0x197   :  { %vm139_vm9 = vmor %vm137_vm8, %vm138_vm6 }
 0x198   :  { %v130_v49 = vsel %vm129_vm5, %v201_v39, %v126_v46  ;;  %v133_v50 = vmul.f32 %v203_v45, %v132_v47 }
 0x199   :  { %v141_v52 = vmul.f32 %v130_v49, %v107_v26 }
 0x19a   :  { %v134_v53 = vmul.f32 0.5, %v133_v50 }
 0x19b   :  { %v147_v54 = vmul.f32 %v196_v48, %v141_v52 }
 0x19c   :  { %v135_v55 = vsub.f32 1.5, %v134_v53 }
 0x19d   :  { %v153_v56 = vadd.f32 %v197_v51, %v147_v54 }
 0x19e   :  { %v136_v57 = vmul.f32 %v203_v45, %v135_v55 }
 0x19f   :  { %v155_v58 = vpack.c.bf16 %v153_v56, %v153_v56 }
 0x1a0   :  { %v140_v59 = vsel %vm139_vm9, %v203_v45, %v136_v57 }
 0x1a1   :  { %158 = vst.msk [vmem:[%s283_s6] sm:$0xf] %vm157_vm7, %v155_v58  ;;  %v142_v60 = vmul.f32 %v140_v59, %v108_v31 }
 0x1a3   :  { %v148_v61 = vmul.f32 %v196_v48, %v142_v60 }
 0x1a5   :  { %v154_v62 = vadd.f32 %v197_v51, %v148_v61 }
 0x1a7   :  { %v156_v63 = vpack.c.bf16 %v154_v62, %v154_v62 }
 0x1a9   :  { %159 = vst.msk [vmem:[%s283_s6 + $0x4] sm:$0xf] %vm157_vm7, %v156_v63 }

</bundles_post_ra>
